<compile_context>
chip_gen: v7x
topology: tpu7x:2x2x1
jax: 0.10.0
libtpu: 0.0.40
codegen_flags: <defaults>
</compile_context>

<pallas_src>
import jax
import jax.numpy as jnp
from jax.experimental import pallas as pl
from jax.experimental.pallas import tpu as pltpu

# Operand dtype fed to the MXU (f32 accumulation always).  bf16 roughly
# doubles MXU rate and halves VMEM/HBM bytes on v6e/v7x.
MXU_DTYPE = jnp.bfloat16


# ----------------------------------------------------------------------------
# Pallas kernels
# ----------------------------------------------------------------------------
def _conv_matmul_t_kernel(w_ref, p_ref, b_ref, o_ref):
    """o = relu(w @ p + b);  w:(Cout,K)  p:(K,TM)  b:(Cout,1)  o:(Cout,TM)."""
    acc = jnp.dot(w_ref[...], p_ref[...], preferred_element_type=jnp.float32)
    acc = jnp.maximum(acc + b_ref[...], 0.0)
    o_ref[...] = acc.astype(o_ref.dtype)


def conv_matmul_t(w_mat, patches_t, bias_col, *, out_dtype, block_m=512):
    """Transposed conv-as-matmul: (Cout,K)@(K,M) + bias, ReLU, lane-dense M."""
    cout, k = w_mat.shape
    k2, m = patches_t.shape
    assert k == k2
    # Full-M block when M is small (exact blocks); otherwise 512-wide lane
    # tiles (ragged tail columns are masked on store).
    tm = min(block_m, m)
    grid = (pl.cdiv(m, tm),)
    return pl.pallas_call(
        _conv_matmul_t_kernel,
        out_shape=jax.ShapeDtypeStruct((cout, m), out_dtype),
        grid=grid,
        in_specs=[
            pl.BlockSpec((cout, k), lambda i: (0, 0)),   # weights: VMEM resident
            pl.BlockSpec((k, tm), lambda i: (0, i)),     # patch-column tile
            pl.BlockSpec((cout, 1), lambda i: (0, 0)),   # bias column
        ],
        out_specs=pl.BlockSpec((cout, tm), lambda i: (0, i)),
        compiler_params=pltpu.CompilerParams(
            dimension_semantics=("parallel",)),
    )(w_mat, patches_t, bias_col)


def _fc_stack_kernel(x_ref, w1_ref, b1_ref, w2_ref, b2_ref, w3_ref, b3_ref,
                     o_ref):
    """Fused fc1(relu) -> fc2(relu) -> fc3; intermediates stay on-chip."""
    h = jnp.dot(x_ref[...], w1_ref[...], preferred_element_type=jnp.float32)
    h = jnp.maximum(h + b1_ref[...], 0.0).astype(w2_ref.dtype)
    h = jnp.dot(h, w2_ref[...], preferred_element_type=jnp.float32)
    h = jnp.maximum(h + b2_ref[...], 0.0).astype(w3_ref.dtype)
    h = jnp.dot(h, w3_ref[...], preferred_element_type=jnp.float32)
    o_ref[...] = (h + b3_ref[...]).astype(o_ref.dtype)


def fc_stack(x, w1, b1, w2, b2, w3, b3, *, block_n=128):
    n, k1 = x.shape
    f1 = w1.shape[1]
    f2 = w2.shape[1]
    f3 = w3.shape[1]
    tn = min(block_n, n)
    grid = (pl.cdiv(n, tn),)
    return pl.pallas_call(
        _fc_stack_kernel,
        out_shape=jax.ShapeDtypeStruct((n, f3), jnp.float32),
        grid=grid,
        in_specs=[
            pl.BlockSpec((tn, k1), lambda i: (i, 0)),   # batch tile of features
            pl.BlockSpec((k1, f1), lambda i: (0, 0)),   # fc1 weights (resident)
            pl.BlockSpec((1, f1), lambda i: (0, 0)),
            pl.BlockSpec((f1, f2), lambda i: (0, 0)),   # fc2 weights (resident)
            pl.BlockSpec((1, f2), lambda i: (0, 0)),
            pl.BlockSpec((f2, f3), lambda i: (0, 0)),   # fc3 weights (resident)
            pl.BlockSpec((1, f3), lambda i: (0, 0)),
        ],
        out_specs=pl.BlockSpec((tn, f3), lambda i: (i, 0)),
        compiler_params=pltpu.CompilerParams(
            dimension_semantics=("parallel",)),
    )(x, w1, b1, w2, b2, w3, b3)


# ----------------------------------------------------------------------------
# Glue (plain JAX, XLA-fused, KB-sized tensors)
# ----------------------------------------------------------------------------
def _im2col_t(x_cnhw, kh, kw):
    """x:(C,N,H,W) -> patches^T:(C*kh*kw, N*OH*OW), valid conv, stride 1.

    Row order is (ci, ki, kj), matching w.reshape(Cout, Cin*kh*kw)."""
    c, n, h, w = x_cnhw.shape
    oh, ow = h - kh + 1, w - kw + 1
    taps = [x_cnhw[:, :, i:i + oh, j:j + ow]
            for i in range(kh) for j in range(kw)]        # each (C,N,OH,OW)
    p = jnp.stack(taps, axis=1)                           # (C, kh*kw, N, OH, OW)
    return p.reshape(c * kh * kw, n * oh * ow), oh, ow


def _max_pool_2x2(y_cnhw):
    """2x2 / stride-2 max pool on (C,N,H,W); exact in bf16, fused by XLA."""
    c, n, h, w = y_cnhw.shape
    assert h % 2 == 0 and w % 2 == 0, "max_pool_2x2 requires even H and W"
    return jnp.maximum(
        jnp.maximum(y_cnhw[:, :, 0::2, 0::2], y_cnhw[:, :, 0::2, 1::2]),
        jnp.maximum(y_cnhw[:, :, 1::2, 0::2], y_cnhw[:, :, 1::2, 1::2]))


def conv2d_relu_t(x_cnhw, w, b, *, out_dtype):
    """Valid conv, stride 1, fused bias+ReLU; channel-major (C,N,OH,OW) out."""
    cout, cin, kh, kw = w.shape
    c, n, _, _ = x_cnhw.shape
    assert c == cin
    patches_t, oh, ow = _im2col_t(x_cnhw, kh, kw)         # (Cin*kh*kw, N*OH*OW)
    y = conv_matmul_t(
        w.reshape(cout, cin * kh * kw).astype(MXU_DTYPE),
        patches_t.astype(MXU_DTYPE),
        b.reshape(cout, 1).astype(jnp.float32),
        out_dtype=out_dtype)
    return y.reshape(cout, n, oh, ow)


# ----------------------------------------------------------------------------
# Net forward (LeNet)
# ----------------------------------------------------------------------------
def init_params(key):
    ks = jax.random.split(key, 10)
    s = 0.1
    return {
        "conv1_w": jax.random.normal(ks[0], (6, 1, 5, 5), jnp.float32) * s,
        "conv1_b": jax.random.normal(ks[1], (6,), jnp.float32) * s,
        "conv2_w": jax.random.normal(ks[2], (16, 6, 5, 5), jnp.float32) * s,
        "conv2_b": jax.random.normal(ks[3], (16,), jnp.float32) * s,
        # Linear weights stored as (in, out); PyTorch stores (out, in), x @ W.T
        "fc1_w": jax.random.normal(ks[4], (16 * 5 * 5, 120), jnp.float32) * s,
        "fc1_b": jax.random.normal(ks[5], (120,), jnp.float32) * s,
        "fc2_w": jax.random.normal(ks[6], (120, 84), jnp.float32) * s,
        "fc2_b": jax.random.normal(ks[7], (84,), jnp.float32) * s,
        "fc3_w": jax.random.normal(ks[8], (84, 10), jnp.float32) * s,
        "fc3_b": jax.random.normal(ks[9], (10,), jnp.float32) * s,
    }


def net_forward(params, x):
    # x: (N, 1, 32, 32) NCHW float32
    n = x.shape[0]
    xc = x.transpose(1, 0, 2, 3)                                   # (1, N, 32, 32)

    # conv1 -> relu (fused) -> maxpool 2x2
    y = conv2d_relu_t(xc, params["conv1_w"], params["conv1_b"],
                      out_dtype=MXU_DTYPE)                         # (6, N, 28, 28)
    y = _max_pool_2x2(y)                                           # (6, N, 14, 14)

    # conv2 -> relu (fused) -> maxpool 2x2
    y = conv2d_relu_t(y, params["conv2_w"], params["conv2_b"],
                      out_dtype=MXU_DTYPE)                         # (16, N, 10, 10)
    y = _max_pool_2x2(y)                                           # (16, N, 5, 5)

    # flatten to PyTorch's x.view(-1, 16*5*5) ordering: (c, h, w) per sample
    feat = y.transpose(1, 0, 2, 3).reshape(n, 16 * 5 * 5)          # (N, 400)

    # fused fc1(relu) -> fc2(relu) -> fc3 in a single Pallas kernel
    return fc_stack(
        feat.astype(MXU_DTYPE),
        params["fc1_w"].astype(MXU_DTYPE),
        params["fc1_b"].reshape(1, -1).astype(jnp.float32),
        params["fc2_w"].astype(MXU_DTYPE),
        params["fc2_b"].reshape(1, -1).astype(jnp.float32),
        params["fc3_w"].astype(MXU_DTYPE),
        params["fc3_b"].reshape(1, -1).astype(jnp.float32),
    )                                                              # (N, 10) f32


if __name__ == "__main__":
    key = jax.random.PRNGKey(0)
    pkey, xkey = jax.random.split(key)
    params = init_params(pkey)
    # LeNet geometry forces 32x32 spatial input (16*5*5 = 400 after conv+pool x2).
    x = jax.random.normal(xkey, (2, 1, 32, 32), jnp.float32)

    fwd = jax.jit(net_forward)
    out = jax.block_until_ready(fwd(params, x))
    assert out.shape == (2, 10), out.shape
    assert out.dtype == jnp.float32
    print("KERNEL_OK")
</pallas_src>

<mosaic_0001>
module attributes {stable_mosaic.version = 11 : i64} {
  func.func @_conv_matmul_t_kernel(%arg0: i32, %arg1: memref<6x25xbf16, #tpu.memory_space<vmem>>, %arg2: memref<25x512xbf16, #tpu.memory_space<vmem>>, %arg3: memref<6x1xf32, #tpu.memory_space<vmem>>, %arg4: memref<6x512xbf16, #tpu.memory_space<vmem>>) attributes {dimension_semantics = [#tpu.dimension_semantics<parallel>], iteration_bounds = array<i64: 4>, scalar_prefetch = 0 : i64, scratch_operands = 0 : i64, tpu.core_type = #tpu.core_type<tc>, window_params = [{pipeline_mode = #tpu.pipeline_mode<synchronous>, transform_indices = @transform_0, window_bounds = array<i64: 6, 25>}, {transform_indices = @transform_1, window_bounds = array<i64: 25, 512>}, {pipeline_mode = #tpu.pipeline_mode<synchronous>, transform_indices = @transform_2, window_bounds = array<i64: 6, 1>}, {transform_indices = @transform_3, window_bounds = array<i64: 6, 512>}]} {
    %c0 = arith.constant 0 : index
    %c0_0 = arith.constant 0 : index
    %0 = vector.load %arg1[%c0, %c0_0] : memref<6x25xbf16, #tpu.memory_space<vmem>>, vector<6x25xbf16>
    %c0_1 = arith.constant 0 : index
    %c0_2 = arith.constant 0 : index
    %1 = vector.load %arg2[%c0_1, %c0_2] : memref<25x512xbf16, #tpu.memory_space<vmem>>, vector<25x512xbf16>
    %cst = arith.constant dense<0.000000e+00> : vector<6x512xf32>
    %2 = tpu.matmul %0, %1, %cst {dimension_numbers = #tpu.dot_dimension_numbers<[1], [0], [0], [1], [0, 0, 1, 1], [], []>} : vector<6x25xbf16>, vector<25x512xbf16>, vector<6x512xf32> -> vector<6x512xf32>
    %c0_3 = arith.constant 0 : index
    %c0_4 = arith.constant 0 : index
    %3 = vector.load %arg3[%c0_3, %c0_4] : memref<6x1xf32, #tpu.memory_space<vmem>>, vector<6x1xf32>
    %4 = vector.broadcast %3 : vector<6x1xf32> to vector<6x512xf32>
    %5 = arith.addf %2, %4 : vector<6x512xf32>
    %cst_5 = arith.constant 0.000000e+00 : f32
    %6 = vector.broadcast %cst_5 : f32 to vector<6x512xf32>
    %7 = arith.maximumf %5, %6 : vector<6x512xf32>
    %8 = arith.truncf %7 : vector<6x512xf32> to vector<6x512xbf16>
    %c0_6 = arith.constant 0 : index
    %c0_7 = arith.constant 0 : index
    %9 = vector.load %arg4[%c0_6, %c0_7] : memref<6x512xbf16, #tpu.memory_space<vmem>>, vector<6x512xbf16>
    tpu.vector_store %arg4[%c0_6, %c0_7], %8 {strides = array<i32>} : memref<6x512xbf16, #tpu.memory_space<vmem>>, vector<6x512xbf16>,
    return
  }
  func.func @transform_0(%arg0: i32) -> (i32, i32) {
    %c0_i32 = arith.constant 0 : i32
    %c0_i32_0 = arith.constant 0 : i32
    %c0_i32_1 = arith.constant 0 : i32
    return %c0_i32, %c0_i32_0 : i32, i32
  }
  func.func @transform_1(%arg0: i32) -> (i32, i32) {
    %c0_i32 = arith.constant 0 : i32
    %c0_i32_0 = arith.constant 0 : i32
    return %c0_i32, %arg0 : i32, i32
  }
  func.func @transform_2(%arg0: i32) -> (i32, i32) {
    %c0_i32 = arith.constant 0 : i32
    %c0_i32_0 = arith.constant 0 : i32
    %c0_i32_1 = arith.constant 0 : i32
    return %c0_i32, %c0_i32_0 : i32, i32
  }
  func.func @transform_3(%arg0: i32) -> (i32, i32) {
    %c0_i32 = arith.constant 0 : i32
    %c0_i32_0 = arith.constant 0 : i32
    return %c0_i32, %arg0 : i32, i32
  }
}

module attributes {stable_mosaic.version = 11 : i64} {
  func.func @_conv_matmul_t_kernel(%arg0: i32, %arg1: memref<16x150xbf16, #tpu.memory_space<vmem>>, %arg2: memref<150x200xbf16, #tpu.memory_space<vmem>>, %arg3: memref<16x1xf32, #tpu.memory_space<vmem>>, %arg4: memref<16x200xbf16, #tpu.memory_space<vmem>>) attributes {dimension_semantics = [#tpu.dimension_semantics<parallel>], iteration_bounds = array<i64: 1>, scalar_prefetch = 0 : i64, scratch_operands = 0 : i64, tpu.core_type = #tpu.core_type<tc>, window_params = [{pipeline_mode = #tpu.pipeline_mode<synchronous>, transform_indices = @transform_0, window_bounds = array<i64: 16, 150>}, {transform_indices = @transform_1, window_bounds = array<i64: 150, 200>}, {pipeline_mode = #tpu.pipeline_mode<synchronous>, transform_indices = @transform_2, window_bounds = array<i64: 16, 1>}, {transform_indices = @transform_3, window_bounds = array<i64: 16, 200>}]} {
    %c0 = arith.constant 0 : index
    %c0_0 = arith.constant 0 : index
    %0 = vector.load %arg1[%c0, %c0_0] : memref<16x150xbf16, #tpu.memory_space<vmem>>, vector<16x150xbf16>
    %c0_1 = arith.constant 0 : index
    %c0_2 = arith.constant 0 : index
    %1 = vector.load %arg2[%c0_1, %c0_2] : memref<150x200xbf16, #tpu.memory_space<vmem>>, vector<150x200xbf16>
    %cst = arith.constant dense<0.000000e+00> : vector<16x200xf32>
    %2 = tpu.matmul %0, %1, %cst {dimension_numbers = #tpu.dot_dimension_numbers<[1], [0], [0], [1], [0, 0, 1, 1], [], []>} : vector<16x150xbf16>, vector<150x200xbf16>, vector<16x200xf32> -> vector<16x200xf32>
    %c0_3 = arith.constant 0 : index
    %c0_4 = arith.constant 0 : index
    %3 = vector.load %arg3[%c0_3, %c0_4] : memref<16x1xf32, #tpu.memory_space<vmem>>, vector<16x1xf32>
    %4 = vector.broadcast %3 : vector<16x1xf32> to vector<16x200xf32>
    %5 = arith.addf %2, %4 : vector<16x200xf32>
    %cst_5 = arith.constant 0.000000e+00 : f32
    %6 = vector.broadcast %cst_5 : f32 to vector<16x200xf32>
    %7 = arith.maximumf %5, %6 : vector<16x200xf32>
    %8 = arith.truncf %7 : vector<16x200xf32> to vector<16x200xbf16>
    %c0_6 = arith.constant 0 : index
    %c0_7 = arith.constant 0 : index
    %9 = vector.load %arg4[%c0_6, %c0_7] : memref<16x200xbf16, #tpu.memory_space<vmem>>, vector<16x200xbf16>
    tpu.vector_store %arg4[%c0_6, %c0_7], %8 {strides = array<i32>} : memref<16x200xbf16, #tpu.memory_space<vmem>>, vector<16x200xbf16>,
    return
  }
  func.func @transform_0(%arg0: i32) -> (i32, i32) {
    %c0_i32 = arith.constant 0 : i32
    %c0_i32_0 = arith.constant 0 : i32
    %c0_i32_1 = arith.constant 0 : i32
    return %c0_i32, %c0_i32_0 : i32, i32
  }
  func.func @transform_1(%arg0: i32) -> (i32, i32) {
    %c0_i32 = arith.constant 0 : i32
    %c0_i32_0 = arith.constant 0 : i32
    return %c0_i32, %arg0 : i32, i32
  }
  func.func @transform_2(%arg0: i32) -> (i32, i32) {
    %c0_i32 = arith.constant 0 : i32
    %c0_i32_0 = arith.constant 0 : i32
    %c0_i32_1 = arith.constant 0 : i32
    return %c0_i32, %c0_i32_0 : i32, i32
  }
  func.func @transform_3(%arg0: i32) -> (i32, i32) {
    %c0_i32 = arith.constant 0 : i32
    %c0_i32_0 = arith.constant 0 : i32
    return %c0_i32, %arg0 : i32, i32
  }
}

module attributes {stable_mosaic.version = 11 : i64} {
  func.func @_fc_stack_kernel(%arg0: i32, %arg1: memref<2x400xbf16, #tpu.memory_space<vmem>>, %arg2: memref<400x120xbf16, #tpu.memory_space<vmem>>, %arg3: memref<1x120xf32, #tpu.memory_space<vmem>>, %arg4: memref<120x84xbf16, #tpu.memory_space<vmem>>, %arg5: memref<1x84xf32, #tpu.memory_space<vmem>>, %arg6: memref<84x10xbf16, #tpu.memory_space<vmem>>, %arg7: memref<1x10xf32, #tpu.memory_space<vmem>>, %arg8: memref<2x10xf32, #tpu.memory_space<vmem>>) attributes {dimension_semantics = [#tpu.dimension_semantics<parallel>], iteration_bounds = array<i64: 1>, scalar_prefetch = 0 : i64, scratch_operands = 0 : i64, tpu.core_type = #tpu.core_type<tc>, window_params = [{transform_indices = @transform_0, window_bounds = array<i64: 2, 400>}, {pipeline_mode = #tpu.pipeline_mode<synchronous>, transform_indices = @transform_1, window_bounds = array<i64: 400, 120>}, {pipeline_mode = #tpu.pipeline_mode<synchronous>, transform_indices = @transform_2, window_bounds = array<i64: 1, 120>}, {pipeline_mode = #tpu.pipeline_mode<synchronous>, transform_indices = @transform_3, window_bounds = array<i64: 120, 84>}, {pipeline_mode = #tpu.pipeline_mode<synchronous>, transform_indices = @transform_4, window_bounds = array<i64: 1, 84>}, {pipeline_mode = #tpu.pipeline_mode<synchronous>, transform_indices = @transform_5, window_bounds = array<i64: 84, 10>}, {pipeline_mode = #tpu.pipeline_mode<synchronous>, transform_indices = @transform_6, window_bounds = array<i64: 1, 10>}, {transform_indices = @transform_7, window_bounds = array<i64: 2, 10>}]} {
    %c0 = arith.constant 0 : index
    %c0_0 = arith.constant 0 : index
    %0 = vector.load %arg1[%c0, %c0_0] : memref<2x400xbf16, #tpu.memory_space<vmem>>, vector<2x400xbf16>
    %c0_1 = arith.constant 0 : index
    %c0_2 = arith.constant 0 : index
    %1 = vector.load %arg2[%c0_1, %c0_2] : memref<400x120xbf16, #tpu.memory_space<vmem>>, vector<400x120xbf16>
    %cst = arith.constant dense<0.000000e+00> : vector<2x120xf32>
    %2 = tpu.matmul %0, %1, %cst {dimension_numbers = #tpu.dot_dimension_numbers<[1], [0], [0], [1], [0, 0, 1, 1], [], []>} : vector<2x400xbf16>, vector<400x120xbf16>, vector<2x120xf32> -> vector<2x120xf32>
    %c0_3 = arith.constant 0 : index
    %c0_4 = arith.constant 0 : index
    %3 = vector.load %arg3[%c0_3, %c0_4] : memref<1x120xf32, #tpu.memory_space<vmem>>, vector<1x120xf32>
    %4 = vector.broadcast %3 : vector<1x120xf32> to vector<2x120xf32>
    %5 = arith.addf %2, %4 : vector<2x120xf32>
    %cst_5 = arith.constant 0.000000e+00 : f32
    %6 = vector.broadcast %cst_5 : f32 to vector<2x120xf32>
    %7 = arith.maximumf %5, %6 : vector<2x120xf32>
    %8 = arith.truncf %7 : vector<2x120xf32> to vector<2x120xbf16>
    %c0_6 = arith.constant 0 : index
    %c0_7 = arith.constant 0 : index
    %9 = vector.load %arg4[%c0_6, %c0_7] : memref<120x84xbf16, #tpu.memory_space<vmem>>, vector<120x84xbf16>
    %cst_8 = arith.constant dense<0.000000e+00> : vector<2x84xf32>
    %10 = tpu.matmul %8, %9, %cst_8 {dimension_numbers = #tpu.dot_dimension_numbers<[1], [0], [0], [1], [0, 0, 1, 1], [], []>} : vector<2x120xbf16>, vector<120x84xbf16>, vector<2x84xf32> -> vector<2x84xf32>
    %c0_9 = arith.constant 0 : index
    %c0_10 = arith.constant 0 : index
    %11 = vector.load %arg5[%c0_9, %c0_10] : memref<1x84xf32, #tpu.memory_space<vmem>>, vector<1x84xf32>
    %12 = vector.broadcast %11 : vector<1x84xf32> to vector<2x84xf32>
    %13 = arith.addf %10, %12 : vector<2x84xf32>
    %cst_11 = arith.constant 0.000000e+00 : f32
    %14 = vector.broadcast %cst_11 : f32 to vector<2x84xf32>
    %15 = arith.maximumf %13, %14 : vector<2x84xf32>
    %16 = arith.truncf %15 : vector<2x84xf32> to vector<2x84xbf16>
    %c0_12 = arith.constant 0 : index
    %c0_13 = arith.constant 0 : index
    %17 = vector.load %arg6[%c0_12, %c0_13] : memref<84x10xbf16, #tpu.memory_space<vmem>>, vector<84x10xbf16>
    %cst_14 = arith.constant dense<0.000000e+00> : vector<2x10xf32>
    %18 = tpu.matmul %16, %17, %cst_14 {dimension_numbers = #tpu.dot_dimension_numbers<[1], [0], [0], [1], [0, 0, 1, 1], [], []>} : vector<2x84xbf16>, vector<84x10xbf16>, vector<2x10xf32> -> vector<2x10xf32>
    %c0_15 = arith.constant 0 : index
    %c0_16 = arith.constant 0 : index
    %19 = vector.load %arg7[%c0_15, %c0_16] : memref<1x10xf32, #tpu.memory_space<vmem>>, vector<1x10xf32>
    %20 = vector.broadcast %19 : vector<1x10xf32> to vector<2x10xf32>
    %21 = arith.addf %18, %20 : vector<2x10xf32>
    %c0_17 = arith.constant 0 : index
    %c0_18 = arith.constant 0 : index
    %22 = vector.load %arg8[%c0_17, %c0_18] : memref<2x10xf32, #tpu.memory_space<vmem>>, vector<2x10xf32>
    tpu.vector_store %arg8[%c0_17, %c0_18], %21 {strides = array<i32>} : memref<2x10xf32, #tpu.memory_space<vmem>>, vector<2x10xf32>,
    return
  }
  func.func @transform_0(%arg0: i32) -> (i32, i32) {
    %c0_i32 = arith.constant 0 : i32
    %c0_i32_0 = arith.constant 0 : i32
    return %arg0, %c0_i32 : i32, i32
  }
  func.func @transform_1(%arg0: i32) -> (i32, i32) {
    %c0_i32 = arith.constant 0 : i32
    %c0_i32_0 = arith.constant 0 : i32
    %c0_i32_1 = arith.constant 0 : i32
    return %c0_i32, %c0_i32_0 : i32, i32
  }
  func.func @transform_2(%arg0: i32) -> (i32, i32) {
    %c0_i32 = arith.constant 0 : i32
    %c0_i32_0 = arith.constant 0 : i32
    %c0_i32_1 = arith.constant 0 : i32
    return %c0_i32, %c0_i32_0 : i32, i32
  }
  func.func @transform_3(%arg0: i32) -> (i32, i32) {
    %c0_i32 = arith.constant 0 : i32
    %c0_i32_0 = arith.constant 0 : i32
    %c0_i32_1 = arith.constant 0 : i32
    return %c0_i32, %c0_i32_0 : i32, i32
  }
  func.func @transform_4(%arg0: i32) -> (i32, i32) {
    %c0_i32 = arith.constant 0 : i32
    %c0_i32_0 = arith.constant 0 : i32
    %c0_i32_1 = arith.constant 0 : i32
    return %c0_i32, %c0_i32_0 : i32, i32
  }
  func.func @transform_5(%arg0: i32) -> (i32, i32) {
    %c0_i32 = arith.constant 0 : i32
    %c0_i32_0 = arith.constant 0 : i32
    %c0_i32_1 = arith.constant 0 : i32
    return %c0_i32, %c0_i32_0 : i32, i32
  }
  func.func @transform_6(%arg0: i32) -> (i32, i32) {
    %c0_i32 = arith.constant 0 : i32
    %c0_i32_0 = arith.constant 0 : i32
    %c0_i32_1 = arith.constant 0 : i32
    return %c0_i32, %c0_i32_0 : i32, i32
  }
  func.func @transform_7(%arg0: i32) -> (i32, i32) {
    %c0_i32 = arith.constant 0 : i32
    %c0_i32_0 = arith.constant 0 : i32
    return %arg0, %c0_i32 : i32, i32
  }
}

</mosaic_0001>

<bundles_post_ra>
// kernel: net_forward.3
= control target key start
LH: loop header
LB: loop body
LE: loop exit
PB: predicated region body
PF: predicated region fallthrough
CT: control target
= control target key end

     0   :  { %s2112_s12 = smov 0   ;;  %s2114_s13 = smov 0   ;;  %s2872_s0 = inlined_call_operand.vmem [shape: bf16[6,25], index: 0, kind: input, shape index: {}]   ;;  %s2873_s1 = inlined_call_operand.vmem [shape: bf16[25,1568], index: 1, kind: input, shape index: {}]   ;;  %s2874_s2 = inlined_call_operand.vmem [shape: f32[6,1], index: 2, kind: input, shape index: {}]   ;;  %s2875_s3 = inlined_call_operand.vmem [shape: bf16[6,1568], index: 3, kind: output, shape index: {}]  }
   0x1   :  { %s2116_s14 = smov 0  }
   0x2 LB: > { %s2128_s15 = sadd.s32 4294967295, %s1956_s14   ;;  %s2131_s16 = sadd.s32 1, %s1956_s14   ;;  %s1956_s14 = sphi %s2116_s14, %s2901_s14   ;;  %s1952_s13 = sphi %s2114_s13, %s2900_s13   ;;  %s1948_s12 = sphi %s2112_s12, %s2899_s12  }
   0x3   : > { %s38_s17 = ssub.s32 %s1956_s14, %s2131_s16  ;;  %s41_s18 = sadd.s32 1, %s1952_s13 }
   0x4   : > { %p39_p0 = scmp.eq.s32.totalorder %s38_s17, 0  ;;  %p48_p1 = scmp.ne.s32.totalorder %s1952_s13, %s1948_s12 }
   0x5   : > { %p49_p2 = scmp.eq.s32.totalorder %s1956_s14, 0  ;;  %p99_p3 = scmp.eq.s32.totalorder %s2128_s15, 3 }
   0x6   : > { %s2141_s19 = scalar_select %p39_p0, %s1952_s13, %s41_s18  }
   0x7   : > { %p50_p4 = por %p49_p2, %p48_p1  ;;  %p2143_p5 = por %p99_p3, %p48_p1 }
   0x8   : > { %p1423_p6 = scmp.ge.s32.totalorder %s1956_s14, 4 }
   0xa   : > { %127 = sbr.rel (%p1423_p6) target bundleno = 149 (0x95), region = 24 }
  0x11   : > { %130 = sbr.rel (!%p50_p4) target bundleno = 149 (0x95), region = 28  ;;  %s132_s21 = sand.u32 (%p50_p4), 1, %s1952_s13  }
  0x12   : > { %s1425_s22 = sshll.u32 (%p50_p4), %s1956_s14, 2  ;;  %s1424_s23 = sshll.u32 (%p50_p4), %s132_s21, 6 }
  0x13   : > { %s136_s24 = ssub.s32 (%p50_p4), 13, %s1425_s22  ;;  %s1495_s25 = sshll.u32 (%p50_p4), %s1956_s14, 4 }
  0x14   : > { %p137_p7 = scmp.lt.s32.totalorder (%p50_p4), %s136_s24, 4  ;;  %s2154_s28 = scalar_lea.vmem (%p50_p4), %s2873_s1, %s1495_s25  }
  0x15   : > { %s2158_s4 = scalar_lea.vmem (%p50_p4), [#allocation2], %s1424_s23  }
  0x18   : > { %s2903_s24 = smov (!%p137_p7, %s136_s24), 4 }
  0x19   : > { %s1426_s29 = sshll.u32 %s2903_s24, 8  ;;  %s2156_s30 = sshll.u32 %s2903_s24, 2 }
  0x1a   : > { %p1430_p8 = scmp.eq.s32.totalorder %s1426_s29, 0 }
  0x1b   : > { %p147_p9 = scmp.lt.u32.totalorder (!%p1430_p8), %s2156_s30, 8 }
  0x1c   : > { %146 = sbr.rel (%p1430_p8) target bundleno = 149 (0x95), region = 32 }
  0x23   : > { %150 = sbr.rel (%p147_p9) target bundleno = 140 (0x8c), region = 36  ;;  %s2162_s5 = sand.u32 (!%p147_p9), 7, %s2156_s30  }
  0x24   : > { %p172_p10 = scmp.eq.s32.totalorder (!%p147_p9), %s2162_s5, 0  ;;  %p1431_p11 = scmp.ne.s32.totalorder (!%p147_p9), %s2162_s5, 0 }
  0x2a   : > { %175 = sbr.rel (%p1431_p11) target bundleno = 88 (0x58), region = 51  ;;  %s176_s6 = sshrl.u32 (!%p1431_p11), %s2156_s30, 3 }
  0x2b   : > { %s2169_s7 = sshrl.u32 (!%p1431_p11), %s176_s6, 4 }
  0x2c   : > { %p1432_p12 = scmp.le.s32.totalorder (!%p1431_p11), %s2169_s7, 0 }
  0x31   : > { %1293 = sbr.rel (%p1432_p12) target bundleno = 68 (0x44), region = 229  ;;  %s2877_s8 = smov (!%p1432_p12), %s2158_s4 }
  0x32   : > { %s2878_s9 = smov (!%p1432_p12), %s2154_s28  ;;  %s2178_s10 = smov (!%p1432_p12), 0  }
  0x33   : > { %s2180_s11 = smov (!%p1432_p12), 0  }
  0x38 LB: >> { %v189_v0 = vld [vmem:[%s1964_s9] sm:$0xff]  ;;  %v191_v1 = vld [vmem:[%s1964_s9 + $0x8] sm:$0xff]  ;;  %v221_v2 = vld [vmem:[%s1964_s9 + $0x34] sm:$0xff]  ;;  %s317_s17 = sadd.s32 1, %s1968_s10  ;;  %s183_s11 = sadd.s32 1, %s1972_s11   ;;  %s1972_s11 = sphi %s2180_s11, %s183_s11   ;;  %s1968_s10 = sphi %s2178_s10, %s2879_s10   ;;  %s1964_s9 = sphi %s2878_s9, %s322_s9   ;;  %s1960_s8 = sphi %s2877_s8, %s323_s8  }
  0x39   : >> { %190 = vst [vmem:[%s1960_s8] sm:$0xff] %v189_v0  ;;  %192 = vst [vmem:[%s1960_s8 + $0x8] sm:$0xff] %v191_v1  ;;  %v223_v3 = vld [vmem:[%s1964_s9 + $0x3c] sm:$0xff]  ;;  %v253_v4 = vld [vmem:[%s1964_s9 + $0x68] sm:$0xff]  ;;  %p318_p13 = scmp.ge.s32.totalorder %s317_s17, %s2169_s7  ;;  %p182_p0 = scmp.ge.s32.totalorder %s183_s11, %s2169_s7 }
  0x3a   : >> { %222 = vst [vmem:[%s1960_s8 + $0x10] sm:$0xff] %v221_v2  ;;  %v255_v5 = vld [vmem:[%s1964_s9 + $0x70] sm:$0xff]  ;;  %224 = vst [vmem:[%s1960_s8 + $0x18] sm:$0xff] %v223_v3  ;;  %v285_v6 = vld [vmem:[%s1964_s9 + $0x9c] sm:$0xff] }
  0x3b   : >> { %254 = vst [vmem:[%s1960_s8 + $0x20] sm:$0xff] %v253_v4  ;;  %256 = vst [vmem:[%s1960_s8 + $0x28] sm:$0xff] %v255_v5  ;;  %v287_v7 = vld [vmem:[%s1964_s9 + $0xa4] sm:$0xff]  ;;  %v289_v8 = vld [vmem:[%s1964_s9 + $0xac] sm:$0xff]  ;;  %s2905_s17 = smov (%p318_p13, %s317_s17), 0 }
  0x3c   : >> { %286 = vst [vmem:[%s1960_s8 + $0x30] sm:$0xff] %v285_v6  ;;  %288 = vst [vmem:[%s1960_s8 + $0x38] sm:$0xff] %v287_v7  ;;  %v291_v9 = vld [vmem:[%s1964_s9 + $0xb4] sm:$0xff]  ;;  %v293_v10 = vld [vmem:[%s1964_s9 + $0xbc] sm:$0xff]  ;;  %s1433_s18 = sshll.u32 %s2905_s17, 7  ;;  %s2879_s10 = smov %s2905_s17 }
  0x3d   : >> { %290 = vst [vmem:[%s1960_s8 + $0x40] sm:$0xff] %v289_v8  ;;  %v295_v11 = vld [vmem:[%s1964_s9 + $0xc4] sm:$0xff]  ;;  %292 = vst [vmem:[%s1960_s8 + $0x48] sm:$0xff] %v291_v9  ;;  %v297_v12 = vld [vmem:[%s1964_s9 + $0xcc] sm:$0xff]  ;;  %185 = sbr.rel (!%p182_p0) target bundleno = 56 (0x38), region = 235 }
  0x3e   : >> { %294 = vst [vmem:[%s1960_s8 + $0x50] sm:$0xff] %v293_v10  ;;  %296 = vst [vmem:[%s1960_s8 + $0x58] sm:$0xff] %v295_v11  ;;  %v299_v13 = vld [vmem:[%s1964_s9 + $0xd4] sm:$0xff]  ;;  %v301_v14 = vld [vmem:[%s1964_s9 + $0xdc] sm:$0xff] }
  0x3f   : >> { %298 = vst [vmem:[%s1960_s8 + $0x60] sm:$0xff] %v297_v12  ;;  %300 = vst [vmem:[%s1960_s8 + $0x68] sm:$0xff] %v299_v13  ;;  %v303_v15 = vld [vmem:[%s1964_s9 + $0xe4] sm:$0xff]  ;;  %v305_v16 = vld [vmem:[%s1964_s9 + $0xec] sm:$0xff] }
  0x40   : >> { %302 = vst [vmem:[%s1960_s8 + $0x70] sm:$0xff] %v301_v14  ;;  %v307_v17 = vld [vmem:[%s1964_s9 + $0xf4] sm:$0xff]  ;;  %304 = vst [vmem:[%s1960_s8 + $0x78] sm:$0xff] %v303_v15  ;;  %v309_v18 = vld [vmem:[%s1964_s9 + $0xfc] sm:$0xff] }
  0x41   : >> { %306 = vst [vmem:[%s1960_s8 + $0x80] sm:$0xff] %v305_v16  ;;  %308 = vst [vmem:[%s1960_s8 + $0x88] sm:$0xff] %v307_v17  ;;  %v311_v19 = vld [vmem:[%s1964_s9 + $0x104] sm:$0xff]  ;;  %v313_v20 = vld [vmem:[%s1964_s9 + $0x10c] sm:$0xff] }
  0x42   : >> { %310 = vst [vmem:[%s1960_s8 + $0x90] sm:$0xff] %v309_v18  ;;  %312 = vst [vmem:[%s1960_s8 + $0x98] sm:$0xff] %v311_v19  ;;  %v315_v21 = vld [vmem:[%s1964_s9 + $0x114] sm:$0xff]  ;;  %s322_s9 = scalar_lea.vmem %s2154_s28, %s1433_s18  }
  0x43   : >> { %314 = vst [vmem:[%s1960_s8 + $0xa0] sm:$0xff] %v313_v20  ;;  %316 = vst [vmem:[%s1960_s8 + $0xa8] sm:$0xff] %v315_v21  ;;  %s323_s8 = scalar_lea.vmem %s2158_s4, %s1433_s18 [#allocation2]  }
  0x44 PF: > { %s2254_s21 = sand.u32 15, %s176_s6   ;;  %s1496_s22 = sshll.u32 %s2169_s7, 11 }
  0x45   : > { %s328_s23 = sshra.s32 %s1496_s22, 4  ;;  %p1438_p1 = scmp.le.s32.totalorder %s2254_s21, 0 }
  0x46   : > { %s2258_s24 = scalar_lea.vmem %s2154_s28, %s328_s23   ;;  %s2261_s25 = scalar_lea.vmem %s2158_s4, %s328_s23 [#allocation2]  }
  0x47   : > { %1307 = sbr.rel (%p1438_p1) target bundleno = 88 (0x58), region = 240  ;;  %s2880_s26 = smov (!%p1438_p1), %s2261_s25 }
  0x48   : > { %s2881_s27 = smov (!%p1438_p1), %s2258_s24  ;;  %s2270_s29 = smov (!%p1438_p1), 0  }
  0x49   : > { %s1986_s8 = smov (!%p1438_p1), 0  }
  0x4e LB: >> { %v344_v22 = vld [vmem:[%s1980_s27] sm:$0xff]  ;;  %v346_v23 = vld [vmem:[%s1980_s27 + $0x34] sm:$0xff]  ;;  %v348_v24 = vld [vmem:[%s1980_s27 + $0x68] sm:$0xff]  ;;  %s352_s6 = sadd.s32 1, %s1984_s29  ;;  %s338_s8 = sadd.s32 1, %s1988_s8   ;;  %s1988_s8 = sphi %s1986_s8, %s338_s8   ;;  %s1984_s29 = sphi %s2270_s29, %s2882_s29   ;;  %s1980_s27 = sphi %s2881_s27, %s357_s27   ;;  %s1976_s26 = sphi %s2880_s26, %s358_s26  }
  0x4f   : >> { %345 = vst [vmem:[%s1976_s26] sm:$0xff] %v344_v22  ;;  %347 = vst [vmem:[%s1976_s26 + $0x10] sm:$0xff] %v346_v23  ;;  %v350_v25 = vld [vmem:[%s1980_s27 + $0x9c] sm:$0xff]  ;;  %p353_p2 = scmp.ge.s32.totalorder %s352_s6, %s2254_s21  ;;  %p337_p3 = scmp.ge.s32.totalorder %s338_s8, %s2254_s21 }
  0x50   : >> { %349 = vst [vmem:[%s1976_s26 + $0x20] sm:$0xff] %v348_v24  ;;  %351 = vst [vmem:[%s1976_s26 + $0x30] sm:$0xff] %v350_v25 }
  0x51   : >> { %s2907_s6 = smov (%p353_p2, %s352_s6), 0  ;;  %340 = sbr.rel (!%p337_p3) target bundleno = 78 (0x4e), region = 246 }
  0x52   : >> { %s1439_s7 = sshll.u32 %s2907_s6, 3  ;;  %s2882_s29 = smov %s2907_s6 }
  0x53   : >> { %s357_s27 = scalar_lea.vmem %s2258_s24, %s1439_s7   ;;  %s358_s26 = scalar_lea.vmem %s2261_s25, %s1439_s7 [#allocation2]  }
  0x58 PF: > { %361 = sbr.rel (%p172_p10) target bundleno = 140 (0x8c), region = 69  ;;  %s363_s9 = ssub.s32 (!%p172_p10), %s2156_s30, %s2162_s5 }
  0x59   : > { %s367_s10 = sshrl.u32 (!%p172_p10), %s2156_s30, 3  ;;  %s2291_s11 = scalar_lea.vmem (!%p172_p10), %s2154_s28, %s363_s9 }
  0x5a   : > { %s2294_s17 = scalar_lea.vmem (!%p172_p10), %s2158_s4, %s363_s9 [#allocation2]  ;;  %s2298_s18 = sshrl.u32 (!%p172_p10), %s367_s10, 4 }
  0x5b   : > { %p1441_p4 = scmp.le.s32.totalorder (!%p172_p10), %s2298_s18, 0 }
  0x5f   : > { %1321 = sbr.rel (%p1441_p4) target bundleno = 114 (0x72), region = 251  ;;  %s2883_s21 = smov (!%p1441_p4), %s2158_s4 }
  0x60   : > { %s2884_s22 = smov (!%p1441_p4), %s2154_s28  ;;  %s2307_s23 = smov (!%p1441_p4), 0  }
  0x61   : > { %s2309_s24 = smov (!%p1441_p4), 0  }
  0x66 LB: >> { %v380_v26 = vld [vmem:[%s1996_s22] sm:$0xff]  ;;  %v382_v27 = vld [vmem:[%s1996_s22 + $0x8] sm:$0xff]  ;;  %v412_v28 = vld [vmem:[%s1996_s22 + $0x34] sm:$0xff]  ;;  %s508_s25 = sadd.s32 1, %s2000_s23  ;;  %s374_s24 = sadd.s32 1, %s2004_s24   ;;  %s2004_s24 = sphi %s2309_s24, %s374_s24   ;;  %s2000_s23 = sphi %s2307_s23, %s2885_s23   ;;  %s1996_s22 = sphi %s2884_s22, %s513_s22   ;;  %s1992_s21 = sphi %s2883_s21, %s514_s21  }
  0x67   : >> { %381 = vst [vmem:[%s1992_s21] sm:$0xff] %v380_v26  ;;  %383 = vst [vmem:[%s1992_s21 + $0x8] sm:$0xff] %v382_v27  ;;  %v414_v29 = vld [vmem:[%s1996_s22 + $0x3c] sm:$0xff]  ;;  %v444_v30 = vld [vmem:[%s1996_s22 + $0x68] sm:$0xff]  ;;  %p509_p6 = scmp.ge.s32.totalorder %s508_s25, %s2298_s18  ;;  %p373_p7 = scmp.ge.s32.totalorder %s374_s24, %s2298_s18 }
  0x68   : >> { %413 = vst [vmem:[%s1992_s21 + $0x10] sm:$0xff] %v412_v28  ;;  %v446_v31 = vld [vmem:[%s1996_s22 + $0x70] sm:$0xff]  ;;  %415 = vst [vmem:[%s1992_s21 + $0x18] sm:$0xff] %v414_v29  ;;  %v476_v32 = vld [vmem:[%s1996_s22 + $0x9c] sm:$0xff] }
  0x69   : >> { %445 = vst [vmem:[%s1992_s21 + $0x20] sm:$0xff] %v444_v30  ;;  %447 = vst [vmem:[%s1992_s21 + $0x28] sm:$0xff] %v446_v31  ;;  %v478_v33 = vld [vmem:[%s1996_s22 + $0xa4] sm:$0xff]  ;;  %v480_v34 = vld [vmem:[%s1996_s22 + $0xac] sm:$0xff]  ;;  %s2909_s25 = smov (%p509_p6, %s508_s25), 0 }
  0x6a   : >> { %477 = vst [vmem:[%s1992_s21 + $0x30] sm:$0xff] %v476_v32  ;;  %479 = vst [vmem:[%s1992_s21 + $0x38] sm:$0xff] %v478_v33  ;;  %v482_v35 = vld [vmem:[%s1996_s22 + $0xb4] sm:$0xff]  ;;  %v484_v36 = vld [vmem:[%s1996_s22 + $0xbc] sm:$0xff]  ;;  %s1442_s26 = sshll.u32 %s2909_s25, 7  ;;  %s2885_s23 = smov %s2909_s25 }
  0x6b   : >> { %481 = vst [vmem:[%s1992_s21 + $0x40] sm:$0xff] %v480_v34  ;;  %v486_v37 = vld [vmem:[%s1996_s22 + $0xc4] sm:$0xff]  ;;  %483 = vst [vmem:[%s1992_s21 + $0x48] sm:$0xff] %v482_v35  ;;  %v488_v38 = vld [vmem:[%s1996_s22 + $0xcc] sm:$0xff]  ;;  %376 = sbr.rel (!%p373_p7) target bundleno = 102 (0x66), region = 257 }
  0x6c   : >> { %485 = vst [vmem:[%s1992_s21 + $0x50] sm:$0xff] %v484_v36  ;;  %487 = vst [vmem:[%s1992_s21 + $0x58] sm:$0xff] %v486_v37  ;;  %v490_v39 = vld [vmem:[%s1996_s22 + $0xd4] sm:$0xff]  ;;  %v492_v40 = vld [vmem:[%s1996_s22 + $0xdc] sm:$0xff] }
  0x6d   : >> { %489 = vst [vmem:[%s1992_s21 + $0x60] sm:$0xff] %v488_v38  ;;  %491 = vst [vmem:[%s1992_s21 + $0x68] sm:$0xff] %v490_v39  ;;  %v494_v41 = vld [vmem:[%s1996_s22 + $0xe4] sm:$0xff]  ;;  %v496_v42 = vld [vmem:[%s1996_s22 + $0xec] sm:$0xff] }
  0x6e   : >> { %493 = vst [vmem:[%s1992_s21 + $0x70] sm:$0xff] %v492_v40  ;;  %v498_v43 = vld [vmem:[%s1996_s22 + $0xf4] sm:$0xff]  ;;  %495 = vst [vmem:[%s1992_s21 + $0x78] sm:$0xff] %v494_v41  ;;  %v500_v44 = vld [vmem:[%s1996_s22 + $0xfc] sm:$0xff] }
  0x6f   : >> { %497 = vst [vmem:[%s1992_s21 + $0x80] sm:$0xff] %v496_v42  ;;  %499 = vst [vmem:[%s1992_s21 + $0x88] sm:$0xff] %v498_v43  ;;  %v502_v45 = vld [vmem:[%s1996_s22 + $0x104] sm:$0xff]  ;;  %v504_v46 = vld [vmem:[%s1996_s22 + $0x10c] sm:$0xff] }
  0x70   : >> { %501 = vst [vmem:[%s1992_s21 + $0x90] sm:$0xff] %v500_v44  ;;  %503 = vst [vmem:[%s1992_s21 + $0x98] sm:$0xff] %v502_v45  ;;  %v506_v47 = vld [vmem:[%s1996_s22 + $0x114] sm:$0xff]  ;;  %s513_s22 = scalar_lea.vmem %s2154_s28, %s1442_s26  }
  0x71   : >> { %505 = vst [vmem:[%s1992_s21 + $0xa0] sm:$0xff] %v504_v46  ;;  %507 = vst [vmem:[%s1992_s21 + $0xa8] sm:$0xff] %v506_v47  ;;  %s514_s21 = scalar_lea.vmem %s2158_s4, %s1442_s26 [#allocation2]  }
  0x72 PF: > { %s2383_s27 = sand.u32 15, %s367_s10   ;;  %s1498_s29 = sshll.u32 %s2298_s18, 11 }
  0x73   : > { %s519_s8 = sshra.s32 %s1498_s29, 4  ;;  %p1447_p8 = scmp.le.s32.totalorder %s2383_s27, 0 }
  0x74   : > { %s2387_s6 = scalar_lea.vmem %s2154_s28, %s519_s8   ;;  %s2390_s7 = scalar_lea.vmem %s2158_s4, %s519_s8 [#allocation2]  }
  0x75   : > { %1335 = sbr.rel (%p1447_p8) target bundleno = 134 (0x86), region = 262  ;;  %s2886_s9 = smov (!%p1447_p8), %s2390_s7 }
  0x76   : > { %s2887_s21 = smov (!%p1447_p8), %s2387_s6  ;;  %s2399_s22 = smov (!%p1447_p8), 0  }
  0x77   : > { %s2018_s23 = smov (!%p1447_p8), 0  }
  0x7c LB: >> { %v535_v48 = vld [vmem:[%s2012_s21] sm:$0xff]  ;;  %v537_v49 = vld [vmem:[%s2012_s21 + $0x34] sm:$0xff]  ;;  %v539_v50 = vld [vmem:[%s2012_s21 + $0x68] sm:$0xff]  ;;  %s543_s10 = sadd.s32 1, %s2016_s22  ;;  %s529_s23 = sadd.s32 1, %s2020_s23   ;;  %s2020_s23 = sphi %s2018_s23, %s529_s23   ;;  %s2016_s22 = sphi %s2399_s22, %s2888_s22   ;;  %s2012_s21 = sphi %s2887_s21, %s548_s21   ;;  %s2008_s9 = sphi %s2886_s9, %s549_s9  }
  0x7d   : >> { %536 = vst [vmem:[%s2008_s9] sm:$0xff] %v535_v48  ;;  %538 = vst [vmem:[%s2008_s9 + $0x10] sm:$0xff] %v537_v49  ;;  %v541_v51 = vld [vmem:[%s2012_s21 + $0x9c] sm:$0xff]  ;;  %p544_p9 = scmp.ge.s32.totalorder %s543_s10, %s2383_s27  ;;  %p528_p10 = scmp.ge.s32.totalorder %s529_s23, %s2383_s27 }
  0x7e   : >> { %540 = vst [vmem:[%s2008_s9 + $0x20] sm:$0xff] %v539_v50  ;;  %542 = vst [vmem:[%s2008_s9 + $0x30] sm:$0xff] %v541_v51 }
  0x7f   : >> { %s2911_s10 = smov (%p544_p9, %s543_s10), 0  ;;  %531 = sbr.rel (!%p528_p10) target bundleno = 124 (0x7c), region = 268 }
  0x80   : >> { %s1448_s18 = sshll.u32 %s2911_s10, 3  ;;  %s2888_s22 = smov %s2911_s10 }
  0x81   : >> { %s548_s21 = scalar_lea.vmem %s2387_s6, %s1448_s18   ;;  %s549_s9 = scalar_lea.vmem %s2390_s7, %s1448_s18 [#allocation2]  }
  0x86 PF: > { %s2086_s24 = smov 0  }
  0x87   : > { %s550_s25 = sshllo.u32 %s2086_s24, %s2162_s5 }
  0x88   : > { %v559_v52 = vld [vmem:[%s2291_s11] sm:%s550_s25]  ;;  %v561_v53 = vld [vmem:[%s2291_s11 + $0x34] sm:%s550_s25] }
  0x89   : > { %560 = vst [vmem:[%s2294_s17] sm:%s550_s25] %v559_v52  ;;  %562 = vst [vmem:[%s2294_s17 + $0x10] sm:%s550_s25] %v561_v53 }
  0x8a   : > { %v563_v54 = vld [vmem:[%s2291_s11 + $0x68] sm:%s550_s25]  ;;  %v565_v55 = vld [vmem:[%s2291_s11 + $0x9c] sm:%s550_s25] }
  0x8b   : > { %564 = vst [vmem:[%s2294_s17 + $0x20] sm:%s550_s25] %v563_v54  ;;  %566 = vst [vmem:[%s2294_s17 + $0x30] sm:%s550_s25] %v565_v55 }
  0x8c PF: > { %p1450_p11 = scmp.ge.u32.totalorder %s2156_s30, 8 }
  0x8d   : > { %s2087_s26 = smov (!%p1450_p11), 0  }
  0x8e   : > { %153 = sbr.rel (%p1450_p11) target bundleno = 149 (0x95), region = 40  ;;  %s154_s5 = sshllo.u32 (!%p1450_p11), %s2087_s26, %s2156_s30 }
  0x8f   : > { %v163_v56 = vld [vmem:[%s2154_s28] sm:%s154_s5] (!%p1450_p11)  ;;  %v165_v57 = vld [vmem:[%s2154_s28 + $0x34] sm:%s154_s5] (!%p1450_p11) }
  0x90   : > { %164 = vst [vmem:[%s2158_s4] sm:%s154_s5] (!%p1450_p11), %v163_v56  ;;  %166 = vst [vmem:[%s2158_s4 + $0x10] sm:%s154_s5] (!%p1450_p11), %v165_v57 }
  0x91   : > { %v167_v58 = vld [vmem:[%s2154_s28 + $0x68] sm:%s154_s5] (!%p1450_p11)  ;;  %v169_v59 = vld [vmem:[%s2154_s28 + $0x9c] sm:%s154_s5] (!%p1450_p11) }
  0x92   : > { %168 = vst [vmem:[%s2158_s4 + $0x20] sm:%s154_s5] (!%p1450_p11), %v167_v58  ;;  %170 = vst [vmem:[%s2158_s4 + $0x30] sm:%s154_s5] (!%p1450_p11), %v169_v59 }
  0x95 PF: > { %p1451_p12 = scmp.ge.s32.totalorder %s1956_s14, 1  ;;  %p569_p13 = scmp.lt.s32.totalorder %s1956_s14, 5 }
  0x97   : > { %p570_p0 = pnand %p1451_p12, %p569_p13 }
  0x98   : > { %s576_s30 = sand.u32 (!%p570_p0), 1, %s1948_s12   ;;  %vm664_vm0 = vcmask (!%p570_p0), 1043456   ;;  %v2088_v60 = vmov (!%p570_p0), 0   ;;  %vm665_vm1 = vcmask (!%p570_p0), 1044480   ;;  %v2089_v61 = vmov (!%p570_p0), 65535  }
  0x99   : > { %573 = sbr.rel (%p570_p0) target bundleno = 549 (0x225), region = 94  ;;  %s1452_s11 = sshll.u32 (!%p570_p0), %s576_s30, 6  ;;  %712 = vmatprep.mubr.bf16.mxu0 (!%p570_p0), %v2088_v60  ;;  %753 = vmatprep.mubr.bf16.mxu1 (!%p570_p0), %v2088_v60  ;;  %v666_v62 = vsel (!%p570_p0), %vm664_vm0, 4294967295, %v2089_v61  ;;  %v618_v63 = vld [vmem:[%s2874_s2] sm:$0x3f] (!%p570_p0)  ;;  %vm660_vm2 = vcmask (!%p570_p0), 203776  }
  0x9a   : > { %1793 = vset.pattern.permute.xlu0 (!%p570_p0), %v2088_v60  ;;  %s578_s14 = scalar_lea.vmem (!%p570_p0), [#allocation2], %s1452_s11  ;;  %v667_v4 = vsel (!%p570_p0), %vm665_vm1, %v666_v62, 0  ;;  %v609_v13 = vld [vmem:[%s2872_s0] sm:$0x7] (!%p570_p0)  ;;  %s1453_s29 = sshll.u32 (!%p570_p0), %s576_s30, 4 }
  0x9b   : > { %v1794_v0 = vld [vmem:[%s578_s14 + $0x4] ss:$16 sps:$4 sm:$0xff] (!%p570_p0)   ;;  %621 = vperm.xlu0 (!%p570_p0), %1793, %v618_v63   ;;  %v1796_v1 = vld [vmem:[%s578_s14 + $0xc] ss:$16 sps:$4 sm:$0xff] (!%p570_p0)   ;;  %v1798_v2 = vld [vmem:[%s578_s14] ss:$16 sps:$4 sm:$0xff] (!%p570_p0)  }
  0x9c   : > { %680 = vmatprep.subr.bf16.mxu0 (!%p570_p0), %v1794_v0  ;;  %v1799_v3 = vld [vmem:[%s578_s14 + $0x8] ss:$16 sps:$4 sm:$0xff] (!%p570_p0)   ;;  %721 = vmatprep.subr.bf16.mxu1 (!%p570_p0), %v1796_v1  ;;  %v1800_v5 = vld [vmem:[%s578_s14 + $0x24] ss:$16 sps:$4 sm:$0x1f] (!%p570_p0)   ;;  %s2446_s8 = scalar_lea.vmem (!%p570_p0), [#allocation3], %s1453_s29  }
  0x9d   : > { %681 = vmatpush1.bf16.msra.mxu0 (!%p570_p0), %v1798_v2  ;;  %722 = vmatpush1.bf16.msra.mxu1 (!%p570_p0), %v1799_v3  ;;  %v1802_v6 = vld [vmem:[%s578_s14 + $0x2c] ss:$16 sps:$4 sm:$0x1f] (!%p570_p0)   ;;  %v672_v7 = vand.u32 (!%p570_p0), %v1800_v5, %v667_v4  ;;  %v1804_v8 = vld [vmem:[%s578_s14 + $0x20] ss:$16 sps:$4 sm:$0x1f] (!%p570_p0)  }
  0x9e   : > { %v1805_v9 = vld [vmem:[%s578_s14 + $0x28] ss:$16 sps:$4 sm:$0x1f] (!%p570_p0)   ;;  %v678_v10 = vand.u32 (!%p570_p0), %v1802_v6, %v667_v4  ;;  %v669_v11 = vand.u32 (!%p570_p0), %v1804_v8, %v667_v4 }
  0x9f   : > { %682 = vmatprep.subr.bf16.mxu0 (!%p570_p0), %v672_v7  ;;  %v675_v12 = vand.u32 (!%p570_p0), %v1805_v9, %v667_v4 }
  0xa0   : > { %723 = vmatprep.subr.bf16.mxu1 %v678_v10  ;;  %s1467_s12 = sshll.u32 (%p2143_p5), %s2128_s15, 2  ;;  %s1502_s6 = sshll.u32 (%p2143_p5), %s2128_s15, 4 }
  0xa1   : > { %683 = vmatpush1.bf16.msra.mxu0 %v669_v11  ;;  %724 = vmatpush1.bf16.msra.mxu1 %v675_v12  ;;  %s792_s7 = ssub.s32 (%p2143_p5), 13, %s1467_s12  ;;  %s2457_s22 = scalar_lea.vmem (%p2143_p5), %s2875_s3, %s1502_s6  }
  0xa2   : > { %p793_p1 = scmp.lt.s32.totalorder (%p2143_p5), %s792_s7, 4 }
  0xa4   : > { %1462 = vmatmul.mubr.msk.bf16.vlgmr.msra.gmra.mrb[0].mxu0 %vm660_vm2, %v609_v13  ;;  %1463 = vmatmul.mubr.msk.bf16.vlgmr.msra.gmra.mrb[0].mxu1 %vm660_vm2, %v609_v13 }
 0x11a   : > { %v622_v14 = vpop.permute.xlu0 %621 }
 0x177   : > { %v714_v15 = vpop.f32.mrb[0].mxu0  ;;  %v755_v16 = vpop.f32.mrb[0].mxu1 }
 0x178   : > { %v715_v17 = vadd.f32 %v714_v15, %v622_v14  ;;  %v756_v18 = vadd.f32 %v755_v16, %v622_v14  ;;  %v716_v19 = vpop.f32.mrb[1].mxu0  ;;  %v757_v20 = vpop.f32.mrb[1].mxu1 }
 0x179   : > { %v717_v21 = vadd.f32 %v716_v19, %v622_v14  ;;  %v758_v22 = vadd.f32 %v757_v20, %v622_v14  ;;  %v718_v23 = vpop.f32.mrb[2].mxu0  ;;  %v759_v24 = vpop.f32.mrb[2].mxu1  ;;  %790 = sbr.rel (!%p2143_p5) target bundleno = 549 (0x225), region = 102 }
 0x17a   : > { %v762_v25 = vmax.f32 %v715_v17, 0.0  ;;  %v764_v26 = vmax.f32 %v756_v18, 0.0  ;;  %v719_v27 = vpop.f32.mrb[3].mxu0  ;;  %v760_v28 = vpop.f32.mrb[3].mxu1 }
 0x17b   : > { %v763_v29 = vmax.f32 %v717_v21, 0.0  ;;  %v765_v30 = vmax.f32 %v758_v22, 0.0 }
 0x17d   : > { %v1500_v31 = vpack.c.bf16 %v763_v29, %v762_v25  ;;  %v1501_v32 = vpack.c.bf16 %v765_v30, %v764_v26 }
 0x17f   : > { %782 = vst [vmem:[%s2446_s8] sm:$0x77] %v1500_v31  ;;  %783 = vst [vmem:[%s2446_s8 + $0x8] sm:$0x77] %v1501_v32 }
 0x180   : > { %s2913_s7 = smov (!%p793_p1, %s792_s7), 4 }
 0x181   : > { %s1468_s23 = sshll.u32 %s2913_s7, 6  ;;  %s2459_s10 = sshll.u32 %s2913_s7, 2 }
 0x182   : > { %p1472_p2 = scmp.eq.s32.totalorder %s1468_s23, 0 }
 0x183   : > { %p803_p3 = scmp.lt.u32.totalorder (!%p1472_p2), %s2459_s10, 8 }
 0x184   : > { %802 = sbr.rel (%p1472_p2) target bundleno = 549 (0x225), region = 106 }
 0x18b   : > { %806 = sbr.rel (%p803_p3) target bundleno = 540 (0x21c), region = 110  ;;  %s2463_s20 = sand.u32 (!%p803_p3), 7, %s2459_s10  }
 0x18c   : > { %p822_p5 = scmp.eq.s32.totalorder (!%p803_p3), %s2463_s20, 0  ;;  %p1473_p4 = scmp.ne.s32.totalorder (!%p803_p3), %s2463_s20, 0 }
 0x192   : > { %825 = sbr.rel (%p1473_p4) target bundleno = 469 (0x1d5), region = 125  ;;  %s826_s15 = sshrl.u32 (!%p1473_p4), %s2459_s10, 3 }
 0x193   : > { %s2470_s18 = sshrl.u32 (!%p1473_p4), %s826_s15, 6 }
 0x194   : > { %p1474_p6 = scmp.le.s32.totalorder (!%p1473_p4), %s2470_s18, 0 }
 0x199   : > { %1349 = sbr.rel (%p1474_p6) target bundleno = 449 (0x1c1), region = 273  ;;  %s2889_s24 = smov (!%p1474_p6), %s2457_s22 }
 0x19a   : > { %s2890_s25 = smov (!%p1474_p6), %s2446_s8  ;;  %s2479_s26 = smov (!%p1474_p6), 0  }
 0x19b   : > { %s2481_s5 = smov (!%p1474_p6), 0  }
 0x1a0 LB: >> { %v839_v33 = vld [vmem:[%s2028_s25] sm:$0xff]  ;;  %v841_v34 = vld [vmem:[%s2028_s25 + $0x8] sm:$0xff]  ;;  %v843_v35 = vld [vmem:[%s2028_s25 + $0x10] sm:$0xff]  ;;  %s967_s30 = sadd.s32 1, %s2032_s26  ;;  %s833_s5 = sadd.s32 1, %s2036_s5   ;;  %s2036_s5 = sphi %s2481_s5, %s833_s5   ;;  %s2032_s26 = sphi %s2479_s26, %s2893_s26   ;;  %s2028_s25 = sphi %s2890_s25, %s2892_s25   ;;  %s2024_s24 = sphi %s2889_s24, %s2891_s24  }
 0x1a1   : >> { %840 = vst [vmem:[%s2024_s24] sm:$0xff] %v839_v33  ;;  %842 = vst [vmem:[%s2024_s24 + $0x8] sm:$0xff] %v841_v34  ;;  %v845_v36 = vld [vmem:[%s2028_s25 + $0x18] sm:$0xff]  ;;  %v847_v37 = vld [vmem:[%s2028_s25 + $0x20] sm:$0xff]  ;;  %p968_p7 = scmp.ge.s32.totalorder %s967_s30, %s2470_s18  ;;  %p832_p8 = scmp.ge.s32.totalorder %s833_s5, %s2470_s18 }
 0x1a2   : >> { %844 = vst [vmem:[%s2024_s24 + $0x10] sm:$0xff] %v843_v35  ;;  %v849_v38 = vld [vmem:[%s2028_s25 + $0x28] sm:$0xff]  ;;  %846 = vst [vmem:[%s2024_s24 + $0x18] sm:$0xff] %v845_v36  ;;  %v851_v39 = vld [vmem:[%s2028_s25 + $0x30] sm:$0xff] }
 0x1a3   : >> { %848 = vst [vmem:[%s2024_s24 + $0x20] sm:$0xff] %v847_v37  ;;  %850 = vst [vmem:[%s2024_s24 + $0x28] sm:$0xff] %v849_v38  ;;  %v853_v40 = vld [vmem:[%s2028_s25 + $0x38] sm:$0xff]  ;;  %v855_v41 = vld [vmem:[%s2028_s25 + $0x40] sm:$0xff]  ;;  %s2915_s30 = smov (%p968_p7, %s967_s30), 0 }
 0x1a4   : >> { %852 = vst [vmem:[%s2024_s24 + $0x30] sm:$0xff] %v851_v39  ;;  %854 = vst [vmem:[%s2024_s24 + $0x38] sm:$0xff] %v853_v40  ;;  %v857_v42 = vld [vmem:[%s2028_s25 + $0x48] sm:$0xff]  ;;  %v859_v43 = vld [vmem:[%s2028_s25 + $0x50] sm:$0xff]  ;;  %s1475_s11 = sshll.u32 %s2915_s30, 9  ;;  %s2893_s26 = smov %s2915_s30 }
 0x1a5   : >> { %856 = vst [vmem:[%s2024_s24 + $0x40] sm:$0xff] %v855_v41  ;;  %v861_v44 = vld [vmem:[%s2028_s25 + $0x58] sm:$0xff]  ;;  %858 = vst [vmem:[%s2024_s24 + $0x48] sm:$0xff] %v857_v42  ;;  %v863_v45 = vld [vmem:[%s2028_s25 + $0x60] sm:$0xff]  ;;  %s2537_s28 = scalar_lea.vmem %s2446_s8, %s1475_s11 [#allocation3]   ;;  %s2540_s4 = scalar_lea.vmem %s2457_s22, %s1475_s11  }
 0x1a6   : >> { %860 = vst [vmem:[%s2024_s24 + $0x50] sm:$0xff] %v859_v43  ;;  %862 = vst [vmem:[%s2024_s24 + $0x58] sm:$0xff] %v861_v44  ;;  %v865_v46 = vld [vmem:[%s2028_s25 + $0x68] sm:$0xff]  ;;  %v867_v47 = vld [vmem:[%s2028_s25 + $0x70] sm:$0xff] }
 0x1a7   : >> { %864 = vst [vmem:[%s2024_s24 + $0x60] sm:$0xff] %v863_v45  ;;  %866 = vst [vmem:[%s2024_s24 + $0x68] sm:$0xff] %v865_v46  ;;  %v869_v48 = vld [vmem:[%s2028_s25 + $0x78] sm:$0xff]  ;;  %v871_v49 = vld [vmem:[%s2028_s25 + $0x80] sm:$0xff] }
 0x1a8   : >> { %868 = vst [vmem:[%s2024_s24 + $0x70] sm:$0xff] %v867_v47  ;;  %v873_v50 = vld [vmem:[%s2028_s25 + $0x88] sm:$0xff]  ;;  %870 = vst [vmem:[%s2024_s24 + $0x78] sm:$0xff] %v869_v48  ;;  %v875_v51 = vld [vmem:[%s2028_s25 + $0x90] sm:$0xff] }
 0x1a9   : >> { %872 = vst [vmem:[%s2024_s24 + $0x80] sm:$0xff] %v871_v49  ;;  %874 = vst [vmem:[%s2024_s24 + $0x88] sm:$0xff] %v873_v50  ;;  %v877_v52 = vld [vmem:[%s2028_s25 + $0x98] sm:$0xff]  ;;  %v879_v53 = vld [vmem:[%s2028_s25 + $0xa0] sm:$0xff] }
 0x1aa   : >> { %876 = vst [vmem:[%s2024_s24 + $0x90] sm:$0xff] %v875_v51  ;;  %878 = vst [vmem:[%s2024_s24 + $0x98] sm:$0xff] %v877_v52  ;;  %v881_v54 = vld [vmem:[%s2028_s25 + $0xa8] sm:$0xff]  ;;  %v883_v55 = vld [vmem:[%s2028_s25 + $0xb0] sm:$0xff] }
 0x1ab   : >> { %880 = vst [vmem:[%s2024_s24 + $0xa0] sm:$0xff] %v879_v53  ;;  %v885_v56 = vld [vmem:[%s2028_s25 + $0xb8] sm:$0xff]  ;;  %882 = vst [vmem:[%s2024_s24 + $0xa8] sm:$0xff] %v881_v54  ;;  %v887_v57 = vld [vmem:[%s2028_s25 + $0xc0] sm:$0xff] }
 0x1ac   : >> { %884 = vst [vmem:[%s2024_s24 + $0xb0] sm:$0xff] %v883_v55  ;;  %886 = vst [vmem:[%s2024_s24 + $0xb8] sm:$0xff] %v885_v56  ;;  %v889_v58 = vld [vmem:[%s2028_s25 + $0xc8] sm:$0xff]  ;;  %v891_v59 = vld [vmem:[%s2028_s25 + $0xd0] sm:$0xff] }
 0x1ad   : >> { %888 = vst [vmem:[%s2024_s24 + $0xc0] sm:$0xff] %v887_v57  ;;  %890 = vst [vmem:[%s2024_s24 + $0xc8] sm:$0xff] %v889_v58  ;;  %v893_v60 = vld [vmem:[%s2028_s25 + $0xd8] sm:$0xff]  ;;  %v895_v61 = vld [vmem:[%s2028_s25 + $0xe0] sm:$0xff] }
 0x1ae   : >> { %892 = vst [vmem:[%s2024_s24 + $0xd0] sm:$0xff] %v891_v59  ;;  %v897_v62 = vld [vmem:[%s2028_s25 + $0xe8] sm:$0xff]  ;;  %894 = vst [vmem:[%s2024_s24 + $0xd8] sm:$0xff] %v893_v60  ;;  %v899_v63 = vld [vmem:[%s2028_s25 + $0xf0] sm:$0xff] }
 0x1af   : >> { %896 = vst [vmem:[%s2024_s24 + $0xe0] sm:$0xff] %v895_v61  ;;  %898 = vst [vmem:[%s2024_s24 + $0xe8] sm:$0xff] %v897_v62  ;;  %v901_v0 = vld [vmem:[%s2028_s25 + $0xf8] sm:$0xff]  ;;  %v903_v1 = vld [vmem:[%s2028_s25 + $0x100] sm:$0xff] }
 0x1b0   : >> { %900 = vst [vmem:[%s2024_s24 + $0xf0] sm:$0xff] %v899_v63  ;;  %902 = vst [vmem:[%s2024_s24 + $0xf8] sm:$0xff] %v901_v0  ;;  %v905_v2 = vld [vmem:[%s2028_s25 + $0x108] sm:$0xff]  ;;  %v907_v3 = vld [vmem:[%s2028_s25 + $0x110] sm:$0xff] }
 0x1b1   : >> { %904 = vst [vmem:[%s2024_s24 + $0x100] sm:$0xff] %v903_v1  ;;  %v909_v4 = vld [vmem:[%s2028_s25 + $0x118] sm:$0xff]  ;;  %906 = vst [vmem:[%s2024_s24 + $0x108] sm:$0xff] %v905_v2  ;;  %v911_v5 = vld [vmem:[%s2028_s25 + $0x120] sm:$0xff] }
 0x1b2   : >> { %908 = vst [vmem:[%s2024_s24 + $0x110] sm:$0xff] %v907_v3  ;;  %910 = vst [vmem:[%s2024_s24 + $0x118] sm:$0xff] %v909_v4  ;;  %v913_v6 = vld [vmem:[%s2028_s25 + $0x128] sm:$0xff]  ;;  %v915_v7 = vld [vmem:[%s2028_s25 + $0x130] sm:$0xff] }
 0x1b3   : >> { %912 = vst [vmem:[%s2024_s24 + $0x120] sm:$0xff] %v911_v5  ;;  %914 = vst [vmem:[%s2024_s24 + $0x128] sm:$0xff] %v913_v6  ;;  %v917_v8 = vld [vmem:[%s2028_s25 + $0x138] sm:$0xff]  ;;  %v919_v9 = vld [vmem:[%s2028_s25 + $0x140] sm:$0xff] }
 0x1b4   : >> { %916 = vst [vmem:[%s2024_s24 + $0x130] sm:$0xff] %v915_v7  ;;  %v921_v10 = vld [vmem:[%s2028_s25 + $0x148] sm:$0xff]  ;;  %918 = vst [vmem:[%s2024_s24 + $0x138] sm:$0xff] %v917_v8  ;;  %v923_v11 = vld [vmem:[%s2028_s25 + $0x150] sm:$0xff] }
 0x1b5   : >> { %920 = vst [vmem:[%s2024_s24 + $0x140] sm:$0xff] %v919_v9  ;;  %922 = vst [vmem:[%s2024_s24 + $0x148] sm:$0xff] %v921_v10  ;;  %v925_v12 = vld [vmem:[%s2028_s25 + $0x158] sm:$0xff]  ;;  %v927_v13 = vld [vmem:[%s2028_s25 + $0x160] sm:$0xff] }
 0x1b6   : >> { %924 = vst [vmem:[%s2024_s24 + $0x150] sm:$0xff] %v923_v11  ;;  %926 = vst [vmem:[%s2024_s24 + $0x158] sm:$0xff] %v925_v12  ;;  %v929_v14 = vld [vmem:[%s2028_s25 + $0x168] sm:$0xff]  ;;  %v931_v15 = vld [vmem:[%s2028_s25 + $0x170] sm:$0xff] }
 0x1b7   : >> { %928 = vst [vmem:[%s2024_s24 + $0x160] sm:$0xff] %v927_v13  ;;  %v933_v16 = vld [vmem:[%s2028_s25 + $0x178] sm:$0xff]  ;;  %930 = vst [vmem:[%s2024_s24 + $0x168] sm:$0xff] %v929_v14  ;;  %v935_v17 = vld [vmem:[%s2028_s25 + $0x180] sm:$0xff] }
 0x1b8   : >> { %932 = vst [vmem:[%s2024_s24 + $0x170] sm:$0xff] %v931_v15  ;;  %934 = vst [vmem:[%s2024_s24 + $0x178] sm:$0xff] %v933_v16  ;;  %v937_v18 = vld [vmem:[%s2028_s25 + $0x188] sm:$0xff]  ;;  %v939_v19 = vld [vmem:[%s2028_s25 + $0x190] sm:$0xff] }
 0x1b9   : >> { %936 = vst [vmem:[%s2024_s24 + $0x180] sm:$0xff] %v935_v17  ;;  %938 = vst [vmem:[%s2024_s24 + $0x188] sm:$0xff] %v937_v18  ;;  %v941_v20 = vld [vmem:[%s2028_s25 + $0x198] sm:$0xff]  ;;  %v943_v21 = vld [vmem:[%s2028_s25 + $0x1a0] sm:$0xff] }
 0x1ba   : >> { %940 = vst [vmem:[%s2024_s24 + $0x190] sm:$0xff] %v939_v19  ;;  %v945_v22 = vld [vmem:[%s2028_s25 + $0x1a8] sm:$0xff]  ;;  %942 = vst [vmem:[%s2024_s24 + $0x198] sm:$0xff] %v941_v20  ;;  %v947_v23 = vld [vmem:[%s2028_s25 + $0x1b0] sm:$0xff]  ;;  %835 = sbr.rel (!%p832_p8) target bundleno = 416 (0x1a0), region = 279 }
 0x1bb   : >> { %944 = vst [vmem:[%s2024_s24 + $0x1a0] sm:$0xff] %v943_v21  ;;  %946 = vst [vmem:[%s2024_s24 + $0x1a8] sm:$0xff] %v945_v22  ;;  %v949_v24 = vld [vmem:[%s2028_s25 + $0x1b8] sm:$0xff]  ;;  %v951_v25 = vld [vmem:[%s2028_s25 + $0x1c0] sm:$0xff] }
 0x1bc   : >> { %948 = vst [vmem:[%s2024_s24 + $0x1b0] sm:$0xff] %v947_v23  ;;  %950 = vst [vmem:[%s2024_s24 + $0x1b8] sm:$0xff] %v949_v24  ;;  %v953_v26 = vld [vmem:[%s2028_s25 + $0x1c8] sm:$0xff]  ;;  %v955_v27 = vld [vmem:[%s2028_s25 + $0x1d0] sm:$0xff] }
 0x1bd   : >> { %952 = vst [vmem:[%s2024_s24 + $0x1c0] sm:$0xff] %v951_v25  ;;  %v957_v28 = vld [vmem:[%s2028_s25 + $0x1d8] sm:$0xff]  ;;  %954 = vst [vmem:[%s2024_s24 + $0x1c8] sm:$0xff] %v953_v26  ;;  %v959_v29 = vld [vmem:[%s2028_s25 + $0x1e0] sm:$0xff] }
 0x1be   : >> { %956 = vst [vmem:[%s2024_s24 + $0x1d0] sm:$0xff] %v955_v27  ;;  %958 = vst [vmem:[%s2024_s24 + $0x1d8] sm:$0xff] %v957_v28  ;;  %v961_v30 = vld [vmem:[%s2028_s25 + $0x1e8] sm:$0xff]  ;;  %v963_v31 = vld [vmem:[%s2028_s25 + $0x1f0] sm:$0xff] }
 0x1bf   : >> { %960 = vst [vmem:[%s2024_s24 + $0x1e0] sm:$0xff] %v959_v29  ;;  %962 = vst [vmem:[%s2024_s24 + $0x1e8] sm:$0xff] %v961_v30  ;;  %v965_v32 = vld [vmem:[%s2028_s25 + $0x1f8] sm:$0xff]  ;;  %s2892_s25 = smov %s2537_s28 }
 0x1c0   : >> { %964 = vst [vmem:[%s2024_s24 + $0x1f0] sm:$0xff] %v963_v31  ;;  %966 = vst [vmem:[%s2024_s24 + $0x1f8] sm:$0xff] %v965_v32  ;;  %s2891_s24 = smov %s2540_s4 }
 0x1c1 PF: > { %s2646_s14 = sand.u32 63, %s826_s15   ;;  %s1503_s17 = sshll.u32 %s2470_s18, 13 }
 0x1c2   : > { %s978_s27 = sshra.s32 %s1503_s17, 4  ;;  %p1480_p9 = scmp.le.s32.totalorder %s2646_s14, 0 }
 0x1c3   : > { %s979_s29 = scalar_lea.vmem %s2446_s8, %s978_s27 [#allocation3]   ;;  %s982_s12 = scalar_lea.vmem %s2457_s22, %s978_s27  }
 0x1c4   : > { %1363 = sbr.rel (%p1480_p9) target bundleno = 469 (0x1d5), region = 284  ;;  %s2038_s6 = smov (!%p1480_p9), %s982_s12  }
 0x1c5   : > { %s2042_s7 = smov (!%p1480_p9), %s979_s29   ;;  %s2046_s9 = smov (!%p1480_p9), 0  }
 0x1c6   : > { %s2050_s21 = smov (!%p1480_p9), 0  }
 0x1cb LB: >> { %v994_v33 = vld [vmem:[%s2044_s7] sm:$0xff]  ;;  %s996_s23 = sadd.s32 1, %s2048_s9  ;;  %s988_s21 = sadd.s32 1, %s2052_s21   ;;  %s2052_s21 = sphi %s2050_s21, %s988_s21   ;;  %s2048_s9 = sphi %s2046_s9, %s2047_s9   ;;  %s2044_s7 = sphi %s2042_s7, %s1001_s7   ;;  %s2040_s6 = sphi %s2038_s6, %s1002_s6  }
 0x1cc   : >> { %995 = vst [vmem:[%s2040_s6] sm:$0xff] %v994_v33  ;;  %p997_p10 = scmp.ge.s32.totalorder %s996_s23, %s2646_s14  ;;  %p987_p11 = scmp.ge.s32.totalorder %s988_s21, %s2646_s14 }
 0x1ce   : >> { %s2917_s23 = smov (%p997_p10, %s996_s23), 0  ;;  %990 = sbr.rel (!%p987_p11) target bundleno = 459 (0x1cb), region = 290 }
 0x1cf   : >> { %s1481_s15 = sshll.u32 %s2917_s23, 3  ;;  %s2047_s9 = smov %s2917_s23  }
 0x1d0   : >> { %s1001_s7 = scalar_lea.vmem %s979_s29, %s1481_s15 [#allocation3]   ;;  %s1002_s6 = scalar_lea.vmem %s982_s12, %s1481_s15  }
 0x1d5 PF: > { %1005 = sbr.rel (%p822_p5) target bundleno = 540 (0x21c), region = 143  ;;  %s2658_s18 = ssub.s32 (!%p822_p5), %s2459_s10, %s2463_s20 }
 0x1d6   : > { %s1011_s24 = sshrl.u32 (!%p822_p5), %s2459_s10, 3  ;;  %s1008_s25 = scalar_lea.vmem (!%p822_p5), %s2446_s8, %s2658_s18 [#allocation3] }
 0x1d7   : > { %s1010_s26 = scalar_lea.vmem (!%p822_p5), %s2457_s22, %s2658_s18  ;;  %s2667_s5 = sshrl.u32 (!%p822_p5), %s1011_s24, 6 }
 0x1d8   : > { %p1483_p12 = scmp.le.s32.totalorder (!%p822_p5), %s2667_s5, 0 }
 0x1dc   : > { %1377 = sbr.rel (%p1483_p12) target bundleno = 516 (0x204), region = 295  ;;  %s2894_s30 = smov (!%p1483_p12), %s2457_s22 }
 0x1dd   : > { %s2895_s11 = smov (!%p1483_p12), %s2446_s8  ;;  %s2676_s28 = smov (!%p1483_p12), 0  }
 0x1de   : > { %s2678_s4 = smov (!%p1483_p12), 0  }
 0x1e3 LB: >> { %v1024_v34 = vld [vmem:[%s2060_s11] sm:$0xff]  ;;  %v1026_v35 = vld [vmem:[%s2060_s11 + $0x8] sm:$0xff]  ;;  %v1028_v36 = vld [vmem:[%s2060_s11 + $0x10] sm:$0xff]  ;;  %s1152_s14 = sadd.s32 1, %s2064_s28  ;;  %s1018_s4 = sadd.s32 1, %s2068_s4   ;;  %s2068_s4 = sphi %s2678_s4, %s1018_s4   ;;  %s2064_s28 = sphi %s2676_s28, %s2898_s28   ;;  %s2060_s11 = sphi %s2895_s11, %s2897_s11   ;;  %s2056_s30 = sphi %s2894_s30, %s2896_s30  }
 0x1e4   : >> { %1025 = vst [vmem:[%s2056_s30] sm:$0xff] %v1024_v34  ;;  %1027 = vst [vmem:[%s2056_s30 + $0x8] sm:$0xff] %v1026_v35  ;;  %v1030_v37 = vld [vmem:[%s2060_s11 + $0x18] sm:$0xff]  ;;  %v1032_v38 = vld [vmem:[%s2060_s11 + $0x20] sm:$0xff]  ;;  %p1153_p13 = scmp.ge.s32.totalorder %s1152_s14, %s2667_s5  ;;  %p1017_p0 = scmp.ge.s32.totalorder %s1018_s4, %s2667_s5 }
 0x1e5   : >> { %1029 = vst [vmem:[%s2056_s30 + $0x10] sm:$0xff] %v1028_v36  ;;  %v1034_v39 = vld [vmem:[%s2060_s11 + $0x28] sm:$0xff]  ;;  %1031 = vst [vmem:[%s2056_s30 + $0x18] sm:$0xff] %v1030_v37  ;;  %v1036_v40 = vld [vmem:[%s2060_s11 + $0x30] sm:$0xff] }
 0x1e6   : >> { %1033 = vst [vmem:[%s2056_s30 + $0x20] sm:$0xff] %v1032_v38  ;;  %1035 = vst [vmem:[%s2056_s30 + $0x28] sm:$0xff] %v1034_v39  ;;  %v1038_v41 = vld [vmem:[%s2060_s11 + $0x38] sm:$0xff]  ;;  %v1040_v42 = vld [vmem:[%s2060_s11 + $0x40] sm:$0xff]  ;;  %s2919_s14 = smov (%p1153_p13, %s1152_s14), 0 }
 0x1e7   : >> { %1037 = vst [vmem:[%s2056_s30 + $0x30] sm:$0xff] %v1036_v40  ;;  %1039 = vst [vmem:[%s2056_s30 + $0x38] sm:$0xff] %v1038_v41  ;;  %v1042_v43 = vld [vmem:[%s2060_s11 + $0x48] sm:$0xff]  ;;  %v1044_v44 = vld [vmem:[%s2060_s11 + $0x50] sm:$0xff]  ;;  %s1484_s17 = sshll.u32 %s2919_s14, 9  ;;  %s2898_s28 = smov %s2919_s14 }
 0x1e8   : >> { %1041 = vst [vmem:[%s2056_s30 + $0x40] sm:$0xff] %v1040_v42  ;;  %v1046_v45 = vld [vmem:[%s2060_s11 + $0x58] sm:$0xff]  ;;  %1043 = vst [vmem:[%s2056_s30 + $0x48] sm:$0xff] %v1042_v43  ;;  %v1048_v46 = vld [vmem:[%s2060_s11 + $0x60] sm:$0xff]  ;;  %s2734_s27 = scalar_lea.vmem %s2446_s8, %s1484_s17 [#allocation3]   ;;  %s2737_s29 = scalar_lea.vmem %s2457_s22, %s1484_s17  }
 0x1e9   : >> { %1045 = vst [vmem:[%s2056_s30 + $0x50] sm:$0xff] %v1044_v44  ;;  %1047 = vst [vmem:[%s2056_s30 + $0x58] sm:$0xff] %v1046_v45  ;;  %v1050_v47 = vld [vmem:[%s2060_s11 + $0x68] sm:$0xff]  ;;  %v1052_v48 = vld [vmem:[%s2060_s11 + $0x70] sm:$0xff] }
 0x1ea   : >> { %1049 = vst [vmem:[%s2056_s30 + $0x60] sm:$0xff] %v1048_v46  ;;  %1051 = vst [vmem:[%s2056_s30 + $0x68] sm:$0xff] %v1050_v47  ;;  %v1054_v49 = vld [vmem:[%s2060_s11 + $0x78] sm:$0xff]  ;;  %v1056_v50 = vld [vmem:[%s2060_s11 + $0x80] sm:$0xff] }
 0x1eb   : >> { %1053 = vst [vmem:[%s2056_s30 + $0x70] sm:$0xff] %v1052_v48  ;;  %v1058_v51 = vld [vmem:[%s2060_s11 + $0x88] sm:$0xff]  ;;  %1055 = vst [vmem:[%s2056_s30 + $0x78] sm:$0xff] %v1054_v49  ;;  %v1060_v52 = vld [vmem:[%s2060_s11 + $0x90] sm:$0xff] }
 0x1ec   : >> { %1057 = vst [vmem:[%s2056_s30 + $0x80] sm:$0xff] %v1056_v50  ;;  %1059 = vst [vmem:[%s2056_s30 + $0x88] sm:$0xff] %v1058_v51  ;;  %v1062_v53 = vld [vmem:[%s2060_s11 + $0x98] sm:$0xff]  ;;  %v1064_v54 = vld [vmem:[%s2060_s11 + $0xa0] sm:$0xff] }
 0x1ed   : >> { %1061 = vst [vmem:[%s2056_s30 + $0x90] sm:$0xff] %v1060_v52  ;;  %1063 = vst [vmem:[%s2056_s30 + $0x98] sm:$0xff] %v1062_v53  ;;  %v1066_v55 = vld [vmem:[%s2060_s11 + $0xa8] sm:$0xff]  ;;  %v1068_v56 = vld [vmem:[%s2060_s11 + $0xb0] sm:$0xff] }
 0x1ee   : >> { %1065 = vst [vmem:[%s2056_s30 + $0xa0] sm:$0xff] %v1064_v54  ;;  %v1070_v57 = vld [vmem:[%s2060_s11 + $0xb8] sm:$0xff]  ;;  %1067 = vst [vmem:[%s2056_s30 + $0xa8] sm:$0xff] %v1066_v55  ;;  %v1072_v58 = vld [vmem:[%s2060_s11 + $0xc0] sm:$0xff] }
 0x1ef   : >> { %1069 = vst [vmem:[%s2056_s30 + $0xb0] sm:$0xff] %v1068_v56  ;;  %1071 = vst [vmem:[%s2056_s30 + $0xb8] sm:$0xff] %v1070_v57  ;;  %v1074_v59 = vld [vmem:[%s2060_s11 + $0xc8] sm:$0xff]  ;;  %v1076_v60 = vld [vmem:[%s2060_s11 + $0xd0] sm:$0xff] }
 0x1f0   : >> { %1073 = vst [vmem:[%s2056_s30 + $0xc0] sm:$0xff] %v1072_v58  ;;  %1075 = vst [vmem:[%s2056_s30 + $0xc8] sm:$0xff] %v1074_v59  ;;  %v1078_v61 = vld [vmem:[%s2060_s11 + $0xd8] sm:$0xff]  ;;  %v1080_v62 = vld [vmem:[%s2060_s11 + $0xe0] sm:$0xff] }
 0x1f1   : >> { %1077 = vst [vmem:[%s2056_s30 + $0xd0] sm:$0xff] %v1076_v60  ;;  %v1082_v63 = vld [vmem:[%s2060_s11 + $0xe8] sm:$0xff]  ;;  %1079 = vst [vmem:[%s2056_s30 + $0xd8] sm:$0xff] %v1078_v61  ;;  %v1084_v0 = vld [vmem:[%s2060_s11 + $0xf0] sm:$0xff] }
 0x1f2   : >> { %1081 = vst [vmem:[%s2056_s30 + $0xe0] sm:$0xff] %v1080_v62  ;;  %1083 = vst [vmem:[%s2056_s30 + $0xe8] sm:$0xff] %v1082_v63  ;;  %v1086_v1 = vld [vmem:[%s2060_s11 + $0xf8] sm:$0xff]  ;;  %v1088_v2 = vld [vmem:[%s2060_s11 + $0x100] sm:$0xff] }
 0x1f3   : >> { %1085 = vst [vmem:[%s2056_s30 + $0xf0] sm:$0xff] %v1084_v0  ;;  %1087 = vst [vmem:[%s2056_s30 + $0xf8] sm:$0xff] %v1086_v1  ;;  %v1090_v3 = vld [vmem:[%s2060_s11 + $0x108] sm:$0xff]  ;;  %v1092_v4 = vld [vmem:[%s2060_s11 + $0x110] sm:$0xff] }
 0x1f4   : >> { %1089 = vst [vmem:[%s2056_s30 + $0x100] sm:$0xff] %v1088_v2  ;;  %v1094_v5 = vld [vmem:[%s2060_s11 + $0x118] sm:$0xff]  ;;  %1091 = vst [vmem:[%s2056_s30 + $0x108] sm:$0xff] %v1090_v3  ;;  %v1096_v6 = vld [vmem:[%s2060_s11 + $0x120] sm:$0xff] }
 0x1f5   : >> { %1093 = vst [vmem:[%s2056_s30 + $0x110] sm:$0xff] %v1092_v4  ;;  %1095 = vst [vmem:[%s2056_s30 + $0x118] sm:$0xff] %v1094_v5  ;;  %v1098_v7 = vld [vmem:[%s2060_s11 + $0x128] sm:$0xff]  ;;  %v1100_v8 = vld [vmem:[%s2060_s11 + $0x130] sm:$0xff] }
 0x1f6   : >> { %1097 = vst [vmem:[%s2056_s30 + $0x120] sm:$0xff] %v1096_v6  ;;  %1099 = vst [vmem:[%s2056_s30 + $0x128] sm:$0xff] %v1098_v7  ;;  %v1102_v9 = vld [vmem:[%s2060_s11 + $0x138] sm:$0xff]  ;;  %v1104_v10 = vld [vmem:[%s2060_s11 + $0x140] sm:$0xff] }
 0x1f7   : >> { %1101 = vst [vmem:[%s2056_s30 + $0x130] sm:$0xff] %v1100_v8  ;;  %v1106_v11 = vld [vmem:[%s2060_s11 + $0x148] sm:$0xff]  ;;  %1103 = vst [vmem:[%s2056_s30 + $0x138] sm:$0xff] %v1102_v9  ;;  %v1108_v12 = vld [vmem:[%s2060_s11 + $0x150] sm:$0xff] }
 0x1f8   : >> { %1105 = vst [vmem:[%s2056_s30 + $0x140] sm:$0xff] %v1104_v10  ;;  %1107 = vst [vmem:[%s2056_s30 + $0x148] sm:$0xff] %v1106_v11  ;;  %v1110_v13 = vld [vmem:[%s2060_s11 + $0x158] sm:$0xff]  ;;  %v1112_v14 = vld [vmem:[%s2060_s11 + $0x160] sm:$0xff] }
 0x1f9   : >> { %1109 = vst [vmem:[%s2056_s30 + $0x150] sm:$0xff] %v1108_v12  ;;  %1111 = vst [vmem:[%s2056_s30 + $0x158] sm:$0xff] %v1110_v13  ;;  %v1114_v15 = vld [vmem:[%s2060_s11 + $0x168] sm:$0xff]  ;;  %v1116_v16 = vld [vmem:[%s2060_s11 + $0x170] sm:$0xff] }
 0x1fa   : >> { %1113 = vst [vmem:[%s2056_s30 + $0x160] sm:$0xff] %v1112_v14  ;;  %v1118_v17 = vld [vmem:[%s2060_s11 + $0x178] sm:$0xff]  ;;  %1115 = vst [vmem:[%s2056_s30 + $0x168] sm:$0xff] %v1114_v15  ;;  %v1120_v18 = vld [vmem:[%s2060_s11 + $0x180] sm:$0xff] }
 0x1fb   : >> { %1117 = vst [vmem:[%s2056_s30 + $0x170] sm:$0xff] %v1116_v16  ;;  %1119 = vst [vmem:[%s2056_s30 + $0x178] sm:$0xff] %v1118_v17  ;;  %v1122_v19 = vld [vmem:[%s2060_s11 + $0x188] sm:$0xff]  ;;  %v1124_v20 = vld [vmem:[%s2060_s11 + $0x190] sm:$0xff] }
 0x1fc   : >> { %1121 = vst [vmem:[%s2056_s30 + $0x180] sm:$0xff] %v1120_v18  ;;  %1123 = vst [vmem:[%s2056_s30 + $0x188] sm:$0xff] %v1122_v19  ;;  %v1126_v21 = vld [vmem:[%s2060_s11 + $0x198] sm:$0xff]  ;;  %v1128_v22 = vld [vmem:[%s2060_s11 + $0x1a0] sm:$0xff] }
 0x1fd   : >> { %1125 = vst [vmem:[%s2056_s30 + $0x190] sm:$0xff] %v1124_v20  ;;  %v1130_v23 = vld [vmem:[%s2060_s11 + $0x1a8] sm:$0xff]  ;;  %1127 = vst [vmem:[%s2056_s30 + $0x198] sm:$0xff] %v1126_v21  ;;  %v1132_v24 = vld [vmem:[%s2060_s11 + $0x1b0] sm:$0xff]  ;;  %1020 = sbr.rel (!%p1017_p0) target bundleno = 483 (0x1e3), region = 301 }
 0x1fe   : >> { %1129 = vst [vmem:[%s2056_s30 + $0x1a0] sm:$0xff] %v1128_v22  ;;  %1131 = vst [vmem:[%s2056_s30 + $0x1a8] sm:$0xff] %v1130_v23  ;;  %v1134_v25 = vld [vmem:[%s2060_s11 + $0x1b8] sm:$0xff]  ;;  %v1136_v26 = vld [vmem:[%s2060_s11 + $0x1c0] sm:$0xff] }
 0x1ff   : >> { %1133 = vst [vmem:[%s2056_s30 + $0x1b0] sm:$0xff] %v1132_v24  ;;  %1135 = vst [vmem:[%s2056_s30 + $0x1b8] sm:$0xff] %v1134_v25  ;;  %v1138_v27 = vld [vmem:[%s2060_s11 + $0x1c8] sm:$0xff]  ;;  %v1140_v28 = vld [vmem:[%s2060_s11 + $0x1d0] sm:$0xff] }
 0x200   : >> { %1137 = vst [vmem:[%s2056_s30 + $0x1c0] sm:$0xff] %v1136_v26  ;;  %v1142_v29 = vld [vmem:[%s2060_s11 + $0x1d8] sm:$0xff]  ;;  %1139 = vst [vmem:[%s2056_s30 + $0x1c8] sm:$0xff] %v1138_v27  ;;  %v1144_v30 = vld [vmem:[%s2060_s11 + $0x1e0] sm:$0xff] }
 0x201   : >> { %1141 = vst [vmem:[%s2056_s30 + $0x1d0] sm:$0xff] %v1140_v28  ;;  %1143 = vst [vmem:[%s2056_s30 + $0x1d8] sm:$0xff] %v1142_v29  ;;  %v1146_v31 = vld [vmem:[%s2060_s11 + $0x1e8] sm:$0xff]  ;;  %v1148_v32 = vld [vmem:[%s2060_s11 + $0x1f0] sm:$0xff] }
 0x202   : >> { %1145 = vst [vmem:[%s2056_s30 + $0x1e0] sm:$0xff] %v1144_v30  ;;  %1147 = vst [vmem:[%s2056_s30 + $0x1e8] sm:$0xff] %v1146_v31  ;;  %v1150_v33 = vld [vmem:[%s2060_s11 + $0x1f8] sm:$0xff]  ;;  %s2897_s11 = smov %s2734_s27 }
 0x203   : >> { %1149 = vst [vmem:[%s2056_s30 + $0x1f0] sm:$0xff] %v1148_v32  ;;  %1151 = vst [vmem:[%s2056_s30 + $0x1f8] sm:$0xff] %v1150_v33  ;;  %s2896_s30 = smov %s2737_s29 }
 0x204 PF: > { %s2843_s12 = sand.u32 63, %s1011_s24   ;;  %s1505_s6 = sshll.u32 %s2667_s5, 13 }
 0x205   : > { %s1163_s7 = sshra.s32 %s1505_s6, 4  ;;  %p1489_p1 = scmp.le.s32.totalorder %s2843_s12, 0 }
 0x206   : > { %s1164_s9 = scalar_lea.vmem %s2446_s8, %s1163_s7 [#allocation3]   ;;  %s1167_s21 = scalar_lea.vmem %s2457_s22, %s1163_s7  }
 0x207   : > { %1391 = sbr.rel (%p1489_p1) target bundleno = 536 (0x218), region = 306  ;;  %s2070_s23 = smov (!%p1489_p1), %s1167_s21  }
 0x208   : > { %s2074_s15 = smov (!%p1489_p1), %s1164_s9   ;;  %s2078_s14 = smov (!%p1489_p1), 0  }
 0x209   : > { %s2082_s4 = smov (!%p1489_p1), 0  }
 0x20e LB: >> { %v1179_v34 = vld [vmem:[%s2076_s15] sm:$0xff]  ;;  %s1181_s24 = sadd.s32 1, %s2080_s14  ;;  %s1173_s4 = sadd.s32 1, %s2084_s4   ;;  %s2084_s4 = sphi %s2082_s4, %s1173_s4   ;;  %s2080_s14 = sphi %s2078_s14, %s2079_s14   ;;  %s2076_s15 = sphi %s2074_s15, %s1186_s15   ;;  %s2072_s23 = sphi %s2070_s23, %s1187_s23  }
 0x20f   : >> { %1180 = vst [vmem:[%s2072_s23] sm:$0xff] %v1179_v34  ;;  %p1182_p2 = scmp.ge.s32.totalorder %s1181_s24, %s2843_s12  ;;  %p1172_p3 = scmp.ge.s32.totalorder %s1173_s4, %s2843_s12 }
 0x211   : >> { %s2921_s24 = smov (%p1182_p2, %s1181_s24), 0  ;;  %1175 = sbr.rel (!%p1172_p3) target bundleno = 526 (0x20e), region = 312 }
 0x212   : >> { %s1490_s5 = sshll.u32 %s2921_s24, 3  ;;  %s2079_s14 = smov %s2921_s24  }
 0x213   : >> { %s1186_s15 = scalar_lea.vmem %s1164_s9, %s1490_s5 [#allocation3]   ;;  %s1187_s23 = scalar_lea.vmem %s1167_s21, %s1490_s5  }
 0x218 PF: > { %s2090_s30 = smov 0  }
 0x219   : > { %s1188_s11 = sshllo.u32 %s2090_s30, %s2463_s20 }
 0x21a   : > { %v1197_v35 = vld [vmem:[%s1008_s25] sm:%s1188_s11] }
 0x21b   : > { %1198 = vst [vmem:[%s1010_s26] sm:%s1188_s11] %v1197_v35 }
 0x21c PF: > { %p1492_p5 = scmp.ge.u32.totalorder %s2459_s10, 8 }
 0x21d   : > { %s2091_s28 = smov (!%p1492_p5), 0  }
 0x21e   : > { %809 = sbr.rel (%p1492_p5) target bundleno = 549 (0x225), region = 114  ;;  %s810_s17 = sshllo.u32 (!%p1492_p5), %s2091_s28, %s2459_s10 }
 0x21f   : > { %v819_v36 = vld [vmem:[%s2446_s8] sm:%s810_s17] (!%p1492_p5) }
 0x220   : > { %820 = vst [vmem:[%s2457_s22] sm:%s810_s17] (!%p1492_p5), %v819_v36 }
 0x225 PF: > { %p10_p4 = scmp.ge.s32.totalorder %s2131_s16, 6   ;;  %s2899_s12 = smov %s1952_s13 }
 0x226   : > { %s2900_s13 = smov %s2141_s19  ;;  %s2901_s14 = smov %s2131_s16 }
 0x227   :  { %12 = sbr.rel (!%p10_p4) target bundleno = 2 (0x2), region = 323 }

// kernel: net_forward.4
= control target key start
LH: loop header
LB: loop body
LE: loop exit
PB: predicated region body
PF: predicated region fallthrough
CT: control target
= control target key end

     0   :  { %v293_v1 = vmov 0   ;;  %vm152_vm0 = vcmask 179200   ;;  %vm156_vm1 = vcmask 1042432   ;;  %vm222_vm2 = vcmask 1043456   ;;  %s389_s1 = inlined_call_operand.vmem [shape: bf16[150,200], index: 1, kind: input, shape index: {}]   ;;  %s390_s0 = inlined_call_operand.vmem [shape: bf16[16,150], index: 0, kind: input, shape index: {}]   ;;  %s391_s2 = inlined_call_operand.vmem [shape: f32[16,1], index: 2, kind: input, shape index: {}]   ;;  %s392_s3 = inlined_call_operand.vmem [shape: bf16[16,200], index: 3, kind: output, shape index: {}]  }
   0x1   :  { %v261_v0 = vld [vmem:[%s389_s1 + $0x4] ss:$8 sps:$4 sm:$0xff]   ;;  %260 = vset.pattern.permute.xlu0 %v293_v1  ;;  %v263_v2 = vld [vmem:[%s389_s1] ss:$8 sps:$4 sm:$0xff]   ;;  %v264_v3 = vld [vmem:[%s389_s1 + $0x14] ss:$8 sps:$4 sm:$0xff]  }
   0x2   :  { %163 = vmatprep.subr.bf16.mxu0 %v261_v0  ;;  %v266_v4 = vld [vmem:[%s389_s1 + $0x10] ss:$8 sps:$4 sm:$0xff]   ;;  %v267_v5 = vld [vmem:[%s389_s1 + $0x24] ss:$8 sps:$4 sm:$0xff]   ;;  %v269_v6 = vld [vmem:[%s389_s1 + $0x20] ss:$8 sps:$4 sm:$0xff]  }
   0x3   :  { %164 = vmatpush1.bf16.msra.mxu0 %v263_v2  ;;  %v270_v7 = vld [vmem:[%s389_s1 + $0x34] ss:$8 sps:$4 sm:$0xff]   ;;  %v272_v8 = vld [vmem:[%s389_s1 + $0x30] ss:$8 sps:$4 sm:$0xff]   ;;  %v273_v9 = vld [vmem:[%s389_s1 + $0x44] ss:$8 sps:$4 sm:$0xff]  }
   0x4   :  { %165 = vmatprep.subr.bf16.mxu0 %v264_v3  ;;  %v292_v10 = vld [vmem:[%s390_s0 + $0x4] ss:$8 sps:$4 sm:$0xff]   ;;  %v275_v12 = vld [vmem:[%s389_s1 + $0x40] ss:$8 sps:$4 sm:$0xff]   ;;  %v276_v14 = vld [vmem:[%s389_s1 + $0x54] ss:$8 sps:$4 sm:$0xff]  }
   0x5   :  { %v36_v11 = vld [vmem:[%s391_s2] sm:$0xff]  ;;  %254 = vmatprep.mubr.msk.bf16.mxu0 %vm152_vm0, %v292_v10  ;;  %v37_v13 = vld [vmem:[%s391_s2 + $0x8] sm:$0xff]  ;;  %v278_v15 = vld [vmem:[%s389_s1 + $0x50] ss:$8 sps:$4 sm:$0xff]   ;;  %vm223_vm3 = vcmask 588804  }
   0x6   :  { %40 = vperm.xlu0 %260, %v36_v11   ;;  %v279_v16 = vld [vmem:[%s389_s1 + $0x64] ss:$8 sps:$4 sm:$0xff]   ;;  %v281_v17 = vld [vmem:[%s389_s1 + $0x60] ss:$8 sps:$4 sm:$0xff]   ;;  %v282_v18 = vld [vmem:[%s389_s1 + $0x74] ss:$8 sps:$4 sm:$0xff]  }
   0x7   :  { %166 = vmatpush1.bf16.msra.mxu0 %v266_v4  ;;  %v284_v19 = vld [vmem:[%s389_s1 + $0x70] ss:$8 sps:$4 sm:$0xff]   ;;  %v285_v20 = vld [vmem:[%s389_s1 + $0x84] ss:$8 sps:$4 sm:$0xff]   ;;  %v287_v22 = vld [vmem:[%s389_s1 + $0x80] ss:$8 sps:$4 sm:$0xff]  }
   0x8   :  { %167 = vmatprep.subr.bf16.mxu0 %v267_v5  ;;  %v35_v21 = vld [vmem:[%s389_s1 + $0x90] sm:$0x77]  ;;  %v290_v26 = vld [vmem:[%s390_s0] ss:$8 sps:$4 sm:$0xff]   ;;  %vm224_vm4 = vmor %vm223_vm3, %vm222_vm2 }
   0x9   :  { %v252_v23 = vcombine.high %v35_v21, %v35_v21  ;;  %v251_v24 = vcombine.low %v35_v21, %v35_v21 }
   0xa   :  { %45 = vperm.xlu0 %260, %v37_v13  }
   0xb   :  { %168 = vmatpush1.bf16.msra.mxu0 %v269_v6  ;;  %v158_v25 = vsel %vm156_vm1, %v251_v24, 0 }
   0xc   :  { %169 = vmatprep.subr.bf16.mxu0 %v270_v7 }
   0xf   :  { %170 = vmatpush1.bf16.msra.mxu0 %v272_v8 }
  0x10   :  { %171 = vmatprep.subr.bf16.mxu0 %v273_v9 }
  0x13   :  { %172 = vmatpush1.bf16.msra.mxu0 %v275_v12 }
  0x14   :  { %173 = vmatprep.subr.bf16.mxu0 %v276_v14 }
  0x17   :  { %174 = vmatpush1.bf16.msra.mxu0 %v278_v15 }
  0x18   :  { %175 = vmatprep.subr.bf16.mxu0 %v279_v16 }
  0x1b   :  { %176 = vmatpush1.bf16.msra.mxu0 %v281_v17 }
  0x1c   :  { %177 = vmatprep.subr.bf16.mxu0 %v282_v18 }
  0x1f   :  { %178 = vmatpush1.bf16.msra.mxu0 %v284_v19 }
  0x20   :  { %179 = vmatprep.subr.bf16.mxu0 %v285_v20 }
  0x23   :  { %180 = vmatpush1.bf16.msra.mxu0 %v287_v22 }
  0x24   :  { %253 = vmatprep.subr.msk.bf16.mxu0 %vm156_vm1, %v252_v23 }
  0x27   :  { %182 = vmatpush1.bf16.msra.mxu0 %v158_v25 }
  0x2a   :  { %196 = vmatmul.mubr.bf16.vlgmr.msra.gmra.mrb[0].mxu0 %v290_v26 }
  0x85   :  { %v41_v27 = vpop.permute.xlu0 %40 }
  0x89   :  { %v46_v31 = vpop.permute.xlu0 %45 }
  0xfd   :  { %v197_v28 = vpop.f32.mrb[0].mxu0 }
  0xfe   :  { %v198_v29 = vadd.f32 %v197_v28, %v41_v27  ;;  %v199_v30 = vpop.f32.mrb[1].mxu0 }
  0xff   :  { %v200_v32 = vadd.f32 %v199_v30, %v41_v27  ;;  %v201_v33 = vpop.f32.mrb[2].mxu0 }
 0x100   :  { %v206_v34 = vmax.f32 %v198_v29, 0.0  ;;  %v202_v35 = vadd.f32 %v201_v33, %v46_v31  ;;  %v203_v36 = vpop.f32.mrb[3].mxu0 }
 0x101   :  { %v207_v37 = vmax.f32 %v200_v32, 0.0  ;;  %v204_v38 = vadd.f32 %v203_v36, %v46_v31 }
 0x102   :  { %v208_v39 = vmax.f32 %v202_v35, 0.0 }
 0x103   :  { %v257_v40 = vpack.c.bf16 %v207_v37, %v206_v34  ;;  %v209_v41 = vmax.f32 %v204_v38, 0.0 }
 0x105   :  { %225 = vst.msk [vmem:[%s392_s3] sm:$0xff] %vm224_vm4, %v257_v40  ;;  %v258_v42 = vpack.c.bf16 %v209_v41, %v208_v39 }
 0x107   :  { %226 = vst.msk [vmem:[%s392_s3 + $0x8] sm:$0xff] %vm224_vm4, %v258_v42 }

// kernel: net_forward.5
= control target key start
LH: loop header
LB: loop body
LE: loop exit
PB: predicated region body
PF: predicated region fallthrough
CT: control target
= control target key end

     0   :  { %v770_v1 = vmov 0   ;;  %v98_v20 = vlaneseq  ;;  %v771_v25 = vmov 1966171168   ;;  %vm264_vm0 = vcmask 130048   ;;  %s981_s0 = inlined_call_operand.vmem [shape: bf16[2,400], index: 0, kind: input, shape index: {}]   ;;  %s982_s1 = inlined_call_operand.vmem [shape: bf16[400,120], index: 1, kind: input, shape index: {}]   ;;  %s983_s2 = inlined_call_operand.vmem [shape: f32[1,120], index: 2, kind: input, shape index: {}]   ;;  %s984_s3 = inlined_call_operand.vmem [shape: bf16[120,84], index: 3, kind: input, shape index: {}]   ;;  %s985_s4 = inlined_call_operand.vmem [shape: f32[1,84], index: 4, kind: input, shape index: {}]   ;;  %s986_s5 = inlined_call_operand.vmem [shape: bf16[84,10], index: 5, kind: input, shape index: {}]   ;;  %s987_s6 = inlined_call_operand.vmem [shape: f32[1,10], index: 6, kind: input, shape index: {}]   ;;  %s988_s7 = inlined_call_operand.hbm [shape: f32[2,10], index: 7, kind: output, shape index: {}]  }
   0x1   :  { %v707_v0 = vld [vmem:[%s982_s1 + $0x40] sm:$0xff]   ;;  %308 = vmatprep.subr.bf16.mxu1 %v770_v1  ;;  %v710_v4 = vld [vmem:[%s982_s1 + $0x48] sm:$0xff]   ;;  %v713_v7 = vld [vmem:[%s982_s1 + $0x50] sm:$0xff]   ;;  %v96_v26 = vunpack.c.l.s4 %v771_v25  ;;  %v772_v38 = vmov 0.0  }
   0x2   :  { %v708_v2 = vld [vmem:[%s982_s1 + $0x80] sm:$0xff]   ;;  %628 = vmatprep.subr.bf16.mxu0 %v707_v0  ;;  %v711_v5 = vld [vmem:[%s982_s1 + $0x88] sm:$0xff]   ;;  %v714_v8 = vld [vmem:[%s982_s1 + $0x90] sm:$0xff]   ;;  %v99_v27 = vshrl.u32 %v98_v20, 7 }
   0x3   :  { %v709_v3 = vld [vmem:[%s982_s1] sm:$0xff]   ;;  %309 = vmatpush1.bf16.msra.mxu1 %v708_v2  ;;  %v712_v6 = vld [vmem:[%s982_s1 + $0x8] sm:$0xff]   ;;  %v715_v9 = vld [vmem:[%s982_s1 + $0x10] sm:$0xff]   ;;  %v97_v30 = vunpack.c.0.s8 %v96_v26 }
   0x4   :  { %629 = vmatpush3.bf16.msra.mxu0 %v709_v3  ;;  %310 = vmatprep.subr.bf16.mxu1 %v770_v1  ;;  %v716_v10 = vld [vmem:[%s982_s1 + $0x58] sm:$0xff]   ;;  %v719_v13 = vld [vmem:[%s982_s1 + $0x60] sm:$0xff]   ;;  %v722_v16 = vld [vmem:[%s982_s1 + $0x68] sm:$0xff]  }
   0x5   :  { %630 = vmatprep.subr.bf16.mxu0 %v710_v4  ;;  %v717_v11 = vld [vmem:[%s982_s1 + $0x98] sm:$0xff]   ;;  %v720_v14 = vld [vmem:[%s982_s1 + $0xa0] sm:$0xff]   ;;  %v723_v17 = vld [vmem:[%s982_s1 + $0xa8] sm:$0xff]   ;;  %v100_v32 = vsub.s32 %v97_v30, %v99_v27 }
   0x6   :  { %v718_v12 = vld [vmem:[%s982_s1 + $0x18] sm:$0xff]   ;;  %v721_v15 = vld [vmem:[%s982_s1 + $0x20] sm:$0xff]   ;;  %v724_v18 = vld [vmem:[%s982_s1 + $0x28] sm:$0xff]  }
   0x7   :  { %311 = vmatpush1.bf16.msra.mxu1 %v711_v5  ;;  %v725_v19 = vld [vmem:[%s982_s1 + $0x70] sm:$0xff]   ;;  %v583_v23 = vld.sshfl [vmem:[%s981_s0] sm:$0x33 pattern:$0x75316420]  ;;  %v728_v24 = vld [vmem:[%s982_s1 + $0x78] sm:$0xff]  }
   0x8   :  { %631 = vmatpush3.bf16.msra.mxu0 %v712_v6  ;;  %312 = vmatprep.subr.bf16.mxu1 %v770_v1  ;;  %v726_v21 = vld [vmem:[%s982_s1 + $0xb0] sm:$0xff]   ;;  %v729_v28 = vld [vmem:[%s982_s1 + $0xb8] sm:$0xff]   ;;  %v94_v29 = vcombine.high %v583_v23, %v583_v23  ;;  %v731_v33 = vld [vmem:[%s982_s1 + $0xc0] sm:$0xff]   ;;  %v101_v36 = vrot.slane %v583_v23, %v100_v32 }
   0x9   :  { %632 = vmatprep.subr.bf16.mxu0 %v713_v7  ;;  %v727_v22 = vld [vmem:[%s982_s1 + $0x30] sm:$0xff]   ;;  %v730_v31 = vld [vmem:[%s982_s1 + $0x38] sm:$0xff]   ;;  %v732_v34 = vld [vmem:[%s984_s3] sm:$0xff]  }
   0xa   :  { %v108_v35 = vrot.slane %v94_v29, %v100_v32  ;;  %v109_v39 = vcombine.high %v101_v36, %v101_v36  ;;  %v733_v40 = vld [vmem:[%s984_s3 + $0x8] sm:$0xff]  }
   0xb   :  { %313 = vmatpush1.bf16.msra.mxu1 %v714_v8 }
   0xc   :  { %633 = vmatpush3.bf16.msra.mxu0 %v715_v9  ;;  %314 = vmatprep.subr.bf16.mxu1 %v770_v1  ;;  %v110_v37 = vcombine.high %v108_v35, %v108_v35 }
   0xd   :  { %634 = vmatprep.subr.bf16.mxu0 %v716_v10  ;;  %300 = vmatprep.mubr.bf16.mxu0 %v108_v35 }
   0xe   :  { %609 = vmatprep.mubr.msk.bf16.mxu1 %vm264_vm0, %v110_v37 }
   0xf   :  { %315 = vmatpush1.bf16.msra.mxu1 %v717_v11 }
  0x10   :  { %635 = vmatpush3.bf16.msra.mxu0 %v718_v12  ;;  %316 = vmatprep.subr.bf16.mxu1 %v770_v1 }
  0x11   :  { %636 = vmatprep.subr.bf16.mxu0 %v719_v13 }
  0x13   :  { %317 = vmatpush1.bf16.msra.mxu1 %v720_v14 }
  0x14   :  { %637 = vmatpush3.bf16.msra.mxu0 %v721_v15  ;;  %318 = vmatprep.subr.bf16.mxu1 %v770_v1 }
  0x15   :  { %638 = vmatprep.subr.bf16.mxu0 %v722_v16 }
  0x17   :  { %319 = vmatpush1.bf16.msra.mxu1 %v723_v17 }
  0x18   :  { %639 = vmatpush3.bf16.msra.mxu0 %v724_v18  ;;  %320 = vmatprep.subr.bf16.mxu1 %v770_v1 }
  0x19   :  { %640 = vmatprep.subr.bf16.mxu0 %v725_v19 }
  0x1b   :  { %321 = vmatpush1.bf16.msra.mxu1 %v726_v21 }
  0x1c   :  { %641 = vmatpush3.bf16.msra.mxu0 %v727_v22  ;;  %322 = vmatprep.subr.bf16.mxu1 %v770_v1 }
  0x1d   :  { %642 = vmatprep.subr.bf16.mxu0 %v728_v24 }
  0x1f   :  { %323 = vmatpush1.bf16.msra.mxu1 %v729_v28 }
  0x20   :  { %643 = vmatpush3.bf16.msra.mxu0 %v730_v31  ;;  %324 = vmatprep.subr.bf16.mxu1 %v770_v1 }
  0x21   :  { %666 = vmatprep.subr.bf16.mxu0 %v772_v38 }
  0x23   :  { %301 = vmatmul.mubr.bf16.vlgmr.msra.gmra.mrb[0].mxu0 %v101_v36  ;;  %325 = vmatpush1.bf16.msra.mxu1 %v731_v33 }
  0x24   :  { %667 = vmatpush3.bf16.msra.mxu0 %v732_v34 }
  0x25   :  { %12 = vsyncpa [#allocation3], 0  ;;  %668 = vmatprep.subr.bf16.mxu0 %v772_v38  ;;  %686 = vmatprep.subr.bf16.mxu1 %v772_v38  ;;  %v734_v41 = vld [vmem:[%s984_s3 + $0x10] sm:$0xff]   ;;  %v735_v42 = vld [vmem:[%s984_s3 + $0x18] sm:$0xff]   ;;  %vm421_vm1 = vcmask 1043456   ;;  %vm773_vm2 = vmmov 0  }
  0x26   :  { %341 = vmatmul.mubr.bf16.vlgmr.msra.gmra.mrb[0].mxu1 %v109_v39  ;;  %v736_v43 = vld [vmem:[%s984_s3 + $0x20] sm:$0xff]   ;;  %v737_v44 = vld [vmem:[%s984_s3 + $0x28] sm:$0xff]   ;;  %v738_v45 = vld [vmem:[%s984_s3 + $0x30] sm:$0xff]   ;;  %682 = vmatprep.mubr.msk.bf16.mxu0 %vm773_vm2, %v772_v38  ;;  %vm417_vm3 = vcmask 982016   ;;  %vm522_vm4 = vcmask 1041408   ;;  %vm518_vm5 = vcmask 687104  }
  0x27   :  { %v739_v46 = vld [vmem:[%s984_s3 + $0x38] ss:$0 sps:$4 sm:$0xff]   ;;  %698 = vmatprep.mubr.msk.bf16.mxu1 %vm773_vm2, %v772_v38  ;;  %v740_v48 = vld [vmem:[%s986_s5] sm:$0xff]   ;;  %v741_v49 = vld [vmem:[%s986_s5 + $0x8] sm:$0xff]   ;;  %vm566_vm6 = vcmask 74752  }
  0x28   :  { %669 = vmatpush3.bf16.msra.mxu0 %v733_v40  ;;  %v423_v47 = vsel %vm421_vm1, %v739_v46, 0  ;;  %687 = vmatpush3.bf16.msra.mxu1 %v740_v48  ;;  %v742_v50 = vld [vmem:[%s986_s5 + $0x10] sm:$0xff]   ;;  %v743_v51 = vld [vmem:[%s986_s5 + $0x18] sm:$0xff]   ;;  %v582_v54 = vld [vmem:[%s983_s2] ss:$0 sm:$0xff] }
  0x29   :  { %670 = vmatprep.subr.bf16.mxu0 %v772_v38  ;;  %688 = vmatprep.subr.bf16.mxu1 %v772_v38  ;;  %v744_v2 = vld [vmem:[%s986_s5 + $0x20] sm:$0xff]   ;;  %v745_v3 = vld [vmem:[%s986_s5 + $0x28] ss:$0 sps:$4 sm:$0x33]   ;;  %s774_s5 = smov [#allocation2]  }
  0x2a   :  { %v524_v4 = vsel %vm522_vm4, %v745_v3, 0  ;;  %v610_v5 = vld [vmem:[%s985_s4] ss:$0 sm:$0xff]  ;;  %s574_s12 = sshll.u32 %s774_s5, 4  ;;  %s575_s12 = int_to_ptr.vmem [resolvable:$true] %s574_s12 }
  0x2b   :  { %v620_v13 = vld [vmem:[%s987_s6] ss:$0 sm:$0xff]  ;;  %s746_s4 = scalar_lea.vmem %s575_s12, 32  ;;  %p751_p1 = scmp.lt.s32.totalorder %s575_s12, %s575_s12 }
  0x2c   :  { %671 = vmatpush3.bf16.msra.mxu0 %v734_v41  ;;  %689 = vmatpush3.bf16.msra.mxu1 %v741_v49  ;;  %p747_p0 = scmp.ne.s32.totalorder %s575_s12, %s746_s4  ;;  %p752_p2 = scmp.lt.s32.totalorder %s746_s4, %s746_s4 }
  0x2d   :  { %672 = vmatprep.subr.bf16.mxu0 %v772_v38  ;;  %690 = vmatprep.subr.bf16.mxu1 %v772_v38 }
  0x2e   :  { %p753_p3 = por %p752_p2, %p751_p1 }
  0x30   :  { %673 = vmatpush3.bf16.msra.mxu0 %v735_v42  ;;  %691 = vmatpush3.bf16.msra.mxu1 %v742_v50  ;;  %p754_p4 = pnand %p753_p3, %p747_p0 }
  0x31   :  { %674 = vmatprep.subr.bf16.mxu0 %v772_v38  ;;  %692 = vmatprep.subr.bf16.mxu1 %v772_v38 }
  0x34   :  { %675 = vmatpush3.bf16.msra.mxu0 %v736_v43  ;;  %693 = vmatpush3.bf16.msra.mxu1 %v743_v51 }
  0x35   :  { %676 = vmatprep.subr.bf16.mxu0 %v772_v38  ;;  %694 = vmatprep.subr.bf16.mxu1 %v772_v38 }
  0x38   :  { %677 = vmatpush3.bf16.msra.mxu0 %v737_v44  ;;  %695 = vmatpush3.bf16.msra.mxu1 %v744_v2 }
  0x39   :  { %678 = vmatprep.subr.bf16.mxu0 %v772_v38  ;;  %696 = vmatprep.subr.bf16.mxu1 %v772_v38 }
  0x3c   :  { %679 = vmatpush3.bf16.msra.mxu0 %v738_v45  ;;  %697 = vmatpush3.bf16.msra.mxu1 %v524_v4 }
  0x3d   :  { %680 = vmatprep.subr.bf16.mxu0 %v772_v38 }
  0x40   :  { %681 = vmatpush3.bf16.msra.mxu0 %v423_v47 }
  0xf6   :  { %v644_v52 = vpop.f32.mrb[0].mxu0 }
  0xf7   :  { %v645_v53 = vpop.f32.mrb[1].mxu0 }
  0xf8   :  { %v646_v55 = vadd.f32 %v645_v53, %v644_v52  ;;  %v647_v56 = vpop.f32.mrb[2].mxu0 }
  0xf9   :  { %v648_v57 = vpop.f32.mrb[3].mxu0  ;;  %v342_v58 = vpop.f32.mrb[0].mxu1 }
  0xfa   :  { %v303_v59 = vadd.f32 %v646_v55, %v582_v54  ;;  %v344_v60 = vpop.f32.mrb[1].mxu1 }
  0xfb   :  { %v345_v61 = vpop.f32.mrb[2].mxu1 }
  0xfc   :  { %v343_v62 = vadd.f32 %v342_v58, %v303_v59  ;;  %v346_v63 = vpop.f32.mrb[3].mxu1 }
  0xfe   :  { %v348_v0 = vmax.f32 %v343_v62, 0.0 }
 0x100   :  { %v349_v1 = vpack.c.bf16 %v348_v0, %v348_v0 }
 0x102   :  { %683 = vmatmul.mubr.msk.bf16.vlgmr.msra.gmra.mrb[4].mxu0 %vm417_vm3, %v349_v1 }
 0x1d5   :  { %v459_v6 = vpop.f32.mrb[4].mxu0 }
 0x1d6   :  { %v460_v7 = vadd.f32 %v610_v5, %v459_v6  ;;  %v684_v8 = vpop.f32.mrb[5].mxu0 }
 0x1d7   :  { %v462_v9 = vpop.f32.mrb[6].mxu0 }
 0x1d8   :  { %v465_v10 = vmax.f32 %v460_v7, 0.0  ;;  %v685_v11 = vpop.f32.mrb[7].mxu0 }
 0x1da   :  { %v466_v12 = vpack.c.bf16 %v465_v10, %v465_v10 }
 0x1dc   :  { %699 = vmatmul.mubr.msk.bf16.vlgmr.msra.gmra.mrb[4].mxu1 %vm518_vm5, %v466_v12 }
 0x2af   :  { %v560_v14 = vpop.f32.mrb[4].mxu1 }
 0x2b0   :  { %v561_v15 = vadd.f32 %v620_v13, %v560_v14  ;;  %v700_v16 = vpop.f32.mrb[5].mxu1 }
 0x2b1   :  { %v563_v17 = vpop.f32.mrb[6].mxu1 }
 0x2b2   :  { %v701_v18 = vpop.f32.mrb[7].mxu1  ;;  %567 = vst.msk [vmem:[#allocation2] sm:$0x3] %vm566_vm6, %v561_v15 }
 0x2b3   :  { %757 = shalt.err (!%p754_p4)
}
 0x2b4   :  { %s758_s6 = scalar_lea.hbm %s988_s7, 32 }
 0x2b5   :  { %p759_p5 = scmp.ne.s32.totalorder %s988_s7, %s758_s6  ;;  %p762_p6 = scmp.lt.u32.totalorder %s758_s6, %s988_s7 }
 0x2b7   :  { %p764_p7 = pnand %p762_p6, %p759_p5 }
 0x2b9   :  { %767 = shalt.err (!%p764_p7)
}
 0x2ba   :  { %577 = dma.vmem_to_hbm [thread:$0]  %s575_s12, 32, %s988_s7, [#allocation3]  }
 0x2bb   :  { %768 = dma.done.wait [#allocation3], 32  }
 0x2bc   :  { %769 = vsyncadd [#allocation3], 4294967264 }
 0x2bd   :  { %581 = vsyncpa [#allocation3], 1 }

</bundles_post_ra>
